<compile_context>
chip_gen: v7x
topology: tpu7x:2x2x1
jax: 0.10.0
libtpu: 0.0.40
codegen_flags: <defaults>
</compile_context>

<pallas_src>
import jax
import jax.numpy as jnp
from jax import lax
from jax.experimental import pallas as pl
from jax.experimental.pallas import tpu as pltpu

# ----------------------------- config (small) -----------------------------
VOCAB = 100
VOCAB_PAD = 128               # padded vocab rows (extra rows are zero, never hit)
MAX_POS = 16
TYPE_VOCAB = 2
HIDDEN = 32
N_HEADS = 2
HEAD_DIM = HIDDEN // N_HEADS
INTERMEDIATE = 64
N_LAYERS = 2
NUM_CATEGORIES = 4
NUM_SUBCATEGORIES = 6
LN_EPS = 1e-12

BATCH = 2
SEQ = 8                        # power of two (batch-id via shift in-kernel)
BS = BATCH * SEQ

LANES = 128                    # lane-padded slab width == packed logits width

# ---- packed matrix-slab row layout (every matrix starts at lane 0) ----
_MAT_LAYER_ROWS = HIDDEN + HIDDEN + HIDDEN + INTERMEDIATE   # wqkv, wo, w1, w2
_ROW_POOL_W = N_LAYERS * _MAT_LAYER_ROWS
_ROW_HEAD_W = _ROW_POOL_W + HIDDEN
MATS_ROWS = _ROW_HEAD_W + HIDDEN                            # 384

# ---- packed bias / LayerNorm vector-slab row layout (one vector per row) ----
_ROW_EMB_G, _ROW_EMB_B = 0, 1
_VEC_LAYER_ROWS = 8            # bqkv, bo, ln1_g, ln1_b, b1, b2, ln2_g, ln2_b
_ROW_POOL_B = 2 + N_LAYERS * _VEC_LAYER_ROWS
_ROW_HEAD_B = _ROW_POOL_B + 1
VECS_ROWS = ((_ROW_HEAD_B + 1 + 7) // 8) * 8                # 24


# --------------------------- fused Pallas kernel ---------------------------
def _fused_bert_kernel(ids_ref, amask_ref, wemb_ref, pte_ref, mats_ref,
                       vecs_ref, out_ref):
    """Single invocation == whole batch.  Everything stays resident in VMEM."""
    f32 = jnp.float32

    def vec(row, width):                       # one packed bias/LN vector
        return vecs_ref[row:row + 1, :width]   # [1, width]

    def layernorm(y, g_row, b_row):
        mu = jnp.mean(y, axis=-1, keepdims=True)
        var = jnp.mean(jnp.square(y - mu), axis=-1, keepdims=True)
        return ((y - mu) * lax.rsqrt(var + LN_EPS)) * vec(g_row, HIDDEN) + vec(b_row, HIDDEN)

    def gelu(y):
        # TODO(synk): HF BERT uses erf-GELU; tanh approximation here (~1e-3 rel. diff).
        return 0.5 * y * (1.0 + jnp.tanh(0.7978845608028654 *
                                         (y + 0.044715 * y * y * y)))

    # ---- embeddings: one-hot gather on the MXU + pre-summed pos/type ----
    ids = ids_ref[...]                                                  # [BS, 1] i32
    vocab_iota = lax.broadcasted_iota(jnp.int32, (BS, VOCAB_PAD), 1)
    onehot = (ids == vocab_iota).astype(f32)                            # [BS, 128]
    x = jnp.dot(onehot, wemb_ref[...], preferred_element_type=f32) + pte_ref[...]
    x = layernorm(x, _ROW_EMB_G, _ROW_EMB_B)                            # [BS, H]

    # ---- additive attention mask: padding mask + block-diagonal batch mask ----
    shift = SEQ.bit_length() - 1                                        # SEQ is 2^k
    row_b = lax.shift_right_logical(
        lax.broadcasted_iota(jnp.int32, (BS, BS), 0), shift)
    col_b = lax.shift_right_logical(
        lax.broadcasted_iota(jnp.int32, (BS, BS), 1), shift)
    add_mask = jnp.where(row_b == col_b, 0.0, -1e9).astype(f32) + amask_ref[...]

    scale = 1.0 / float(HEAD_DIM) ** 0.5
    for layer in range(N_LAYERS):
        mbase = layer * _MAT_LAYER_ROWS
        wqkv = mats_ref[mbase:mbase + HIDDEN, :3 * HIDDEN]               # [H, 3H]
        wo = mats_ref[mbase + HIDDEN:mbase + 2 * HIDDEN, :HIDDEN]        # [H, H]
        w1 = mats_ref[mbase + 2 * HIDDEN:mbase + 3 * HIDDEN, :INTERMEDIATE]
        w2 = mats_ref[mbase + 3 * HIDDEN:
                      mbase + 3 * HIDDEN + INTERMEDIATE, :HIDDEN]        # [I, H]
        vbase = 2 + layer * _VEC_LAYER_ROWS

        # fused QKV projection: one matmul over the folded batch           [BS, 3H]
        qkv = jnp.dot(x, wqkv, preferred_element_type=f32) + vec(vbase + 0, 3 * HIDDEN)

        # per-head attention over the block-diagonal [BS, BS] score matrix
        ctx_heads = []
        for h in range(N_HEADS):
            lo = h * HEAD_DIM
            q = qkv[:, lo:lo + HEAD_DIM]                                  # [BS, Dh]
            k = qkv[:, HIDDEN + lo:HIDDEN + lo + HEAD_DIM]
            v = qkv[:, 2 * HIDDEN + lo:2 * HIDDEN + lo + HEAD_DIM]
            s = lax.dot_general(q, k, (((1,), (1,)), ((), ())),
                                preferred_element_type=f32) * scale + add_mask
            s = s - jnp.max(s, axis=-1, keepdims=True)
            p = jnp.exp(s)
            p = p / jnp.sum(p, axis=-1, keepdims=True)
            ctx_heads.append(jnp.dot(p, v, preferred_element_type=f32))   # [BS, Dh]
        ctx = jnp.concatenate(ctx_heads, axis=1)                          # [BS, H]

        # single output projection + residual + LayerNorm
        attn = jnp.dot(ctx, wo, preferred_element_type=f32) + vec(vbase + 1, HIDDEN)
        x = layernorm(attn + x, vbase + 2, vbase + 3)

        # FFN with fused residual + LayerNorm
        ff = gelu(jnp.dot(x, w1, preferred_element_type=f32)
                  + vec(vbase + 4, INTERMEDIATE))
        ff = jnp.dot(ff, w2, preferred_element_type=f32) + vec(vbase + 5, HIDDEN)
        x = layernorm(ff + x, vbase + 6, vbase + 7)

    # ---- pooler on each sample's CLS token + packed classification heads ----
    pooler_w = mats_ref[_ROW_POOL_W:_ROW_POOL_W + HIDDEN, :HIDDEN]
    head_w = mats_ref[_ROW_HEAD_W:_ROW_HEAD_W + HIDDEN, :LANES]
    cls = jnp.concatenate([x[b * SEQ:b * SEQ + 1, :] for b in range(BATCH)],
                          axis=0)                                         # [B, H]
    pooled = jnp.tanh(jnp.dot(cls, pooler_w, preferred_element_type=f32)
                      + vec(_ROW_POOL_B, HIDDEN))
    # Dropout(0.3) is identity at inference time.
    out_ref[...] = (jnp.dot(pooled, head_w, preferred_element_type=f32)
                    + vec(_ROW_HEAD_B, LANES))                            # [B, 128]


# --------------------------- params (synthetic) -----------------------------
def init_params(key):
    def nrm(k, shape, scale=0.02):
        return (scale * jax.random.normal(k, shape)).astype(jnp.float32)

    keys = jax.random.split(key, 8 + 16 * N_LAYERS)
    it = iter(keys)
    p = {
        "word_emb": nrm(next(it), (VOCAB, HIDDEN)),
        "pos_emb": nrm(next(it), (MAX_POS, HIDDEN)),
        "type_emb": nrm(next(it), (TYPE_VOCAB, HIDDEN)),
        "emb_ln_g": jnp.ones((HIDDEN,), jnp.float32),
        "emb_ln_b": jnp.zeros((HIDDEN,), jnp.float32),
        "pooler_w": nrm(next(it), (HIDDEN, HIDDEN)),
        "pooler_b": jnp.zeros((HIDDEN,), jnp.float32),
        "cat_w": nrm(next(it), (HIDDEN, NUM_CATEGORIES)),
        "cat_b": jnp.zeros((NUM_CATEGORIES,), jnp.float32),
        "sub_w": nrm(next(it), (HIDDEN, NUM_SUBCATEGORIES)),
        "sub_b": jnp.zeros((NUM_SUBCATEGORIES,), jnp.float32),
        "layers": [],
    }
    for _ in range(N_LAYERS):
        layer = {
            "wq": nrm(next(it), (HIDDEN, HIDDEN)), "bq": jnp.zeros((HIDDEN,), jnp.float32),
            "wk": nrm(next(it), (HIDDEN, HIDDEN)), "bk": jnp.zeros((HIDDEN,), jnp.float32),
            "wv": nrm(next(it), (HIDDEN, HIDDEN)), "bv": jnp.zeros((HIDDEN,), jnp.float32),
            "wo": nrm(next(it), (HIDDEN, HIDDEN)), "bo": jnp.zeros((HIDDEN,), jnp.float32),
            "ln1_g": jnp.ones((HIDDEN,), jnp.float32), "ln1_b": jnp.zeros((HIDDEN,), jnp.float32),
            "w1": nrm(next(it), (HIDDEN, INTERMEDIATE)), "b1": jnp.zeros((INTERMEDIATE,), jnp.float32),
            "w2": nrm(next(it), (INTERMEDIATE, HIDDEN)), "b2": jnp.zeros((HIDDEN,), jnp.float32),
            "ln2_g": jnp.ones((HIDDEN,), jnp.float32), "ln2_b": jnp.zeros((HIDDEN,), jnp.float32),
        }
        p["layers"].append(layer)
    return p


def pack_params(p):
    """ONE-TIME packing of all weights into a few lane-padded VMEM slabs."""
    f32 = jnp.float32

    # padded word-embedding table; rows >= VOCAB are zero and never selected.
    wemb = jnp.zeros((VOCAB_PAD, HIDDEN), f32).at[:VOCAB].set(p["word_emb"])

    # pre-summed position + token-type(=0) embeddings, tiled over the folded batch.
    pte = jnp.tile(p["pos_emb"][:SEQ] + p["type_emb"][0][None, :], (BATCH, 1))  # [BS, H]

    mats = jnp.zeros((MATS_ROWS, LANES), f32)
    vecs = jnp.zeros((VECS_ROWS, LANES), f32)

    vecs = vecs.at[_ROW_EMB_G, :HIDDEN].set(p["emb_ln_g"])
    vecs = vecs.at[_ROW_EMB_B, :HIDDEN].set(p["emb_ln_b"])

    for l, lp in enumerate(p["layers"]):
        mbase = l * _MAT_LAYER_ROWS
        wqkv = jnp.concatenate([lp["wq"], lp["wk"], lp["wv"]], axis=1)          # [H, 3H]
        mats = mats.at[mbase:mbase + HIDDEN, :3 * HIDDEN].set(wqkv)
        mats = mats.at[mbase + HIDDEN:mbase + 2 * HIDDEN, :HIDDEN].set(lp["wo"])
        mats = mats.at[mbase + 2 * HIDDEN:mbase + 3 * HIDDEN, :INTERMEDIATE].set(lp["w1"])
        mats = mats.at[mbase + 3 * HIDDEN:
                       mbase + 3 * HIDDEN + INTERMEDIATE, :HIDDEN].set(lp["w2"])

        vbase = 2 + l * _VEC_LAYER_ROWS
        bqkv = jnp.concatenate([lp["bq"], lp["bk"], lp["bv"]])
        vecs = vecs.at[vbase + 0, :3 * HIDDEN].set(bqkv)
        vecs = vecs.at[vbase + 1, :HIDDEN].set(lp["bo"])
        vecs = vecs.at[vbase + 2, :HIDDEN].set(lp["ln1_g"])
        vecs = vecs.at[vbase + 3, :HIDDEN].set(lp["ln1_b"])
        vecs = vecs.at[vbase + 4, :INTERMEDIATE].set(lp["b1"])
        vecs = vecs.at[vbase + 5, :HIDDEN].set(lp["b2"])
        vecs = vecs.at[vbase + 6, :HIDDEN].set(lp["ln2_g"])
        vecs = vecs.at[vbase + 7, :HIDDEN].set(lp["ln2_b"])

    mats = mats.at[_ROW_POOL_W:_ROW_POOL_W + HIDDEN, :HIDDEN].set(p["pooler_w"])
    mats = mats.at[_ROW_HEAD_W:_ROW_HEAD_W + HIDDEN, :NUM_CATEGORIES].set(p["cat_w"])
    mats = mats.at[_ROW_HEAD_W:_ROW_HEAD_W + HIDDEN,
                   NUM_CATEGORIES:NUM_CATEGORIES + NUM_SUBCATEGORIES].set(p["sub_w"])
    vecs = vecs.at[_ROW_POOL_B, :HIDDEN].set(p["pooler_b"])
    vecs = vecs.at[_ROW_HEAD_B, :NUM_CATEGORIES].set(p["cat_b"])
    vecs = vecs.at[_ROW_HEAD_B,
                   NUM_CATEGORIES:NUM_CATEGORIES + NUM_SUBCATEGORIES].set(p["sub_b"])

    return {"wemb": wemb, "pte": pte, "mats": mats, "vecs": vecs}


# ------------------------------ forward pass --------------------------------
@jax.jit
def multi_output_bert_forward(packed, input_ids, attention_mask):
    # Per-call glue is tiny: fold the batch for the kernel + additive mask cast.
    ids = input_ids.reshape(BS, 1).astype(jnp.int32)                        # [BS, 1]
    amask = (1.0 - attention_mask.reshape(1, BS).astype(jnp.float32)) * -10000.0

    logits = pl.pallas_call(
        _fused_bert_kernel,
        out_shape=jax.ShapeDtypeStruct((BATCH, LANES), jnp.float32),
        grid=(1,),
        in_specs=[
            pl.BlockSpec((BS, 1), lambda i: (0, 0)),              # token ids
            pl.BlockSpec((1, BS), lambda i: (0, 0)),              # additive pad mask
            pl.BlockSpec((VOCAB_PAD, HIDDEN), lambda i: (0, 0)),  # word-emb table
            pl.BlockSpec((BS, HIDDEN), lambda i: (0, 0)),         # pos+type emb
            pl.BlockSpec((MATS_ROWS, LANES), lambda i: (0, 0)),   # matrix slab
            pl.BlockSpec((VECS_ROWS, LANES), lambda i: (0, 0)),   # bias/LN slab
        ],
        out_specs=pl.BlockSpec((BATCH, LANES), lambda i: (0, 0)),
        compiler_params=pltpu.CompilerParams(
            dimension_semantics=("arbitrary",)),
    )(ids, amask, packed["wemb"], packed["pte"], packed["mats"], packed["vecs"])

    category_logits = logits[:, :NUM_CATEGORIES]
    subcategory_logits = logits[:, NUM_CATEGORIES:NUM_CATEGORIES + NUM_SUBCATEGORIES]
    return category_logits, subcategory_logits


# ------------------------------- driver ------------------------------------
if __name__ == "__main__":
    key = jax.random.PRNGKey(0)
    pkey, ikey = jax.random.split(key)

    params = init_params(pkey)
    packed = pack_params(params)          # one-time weight packing (not per call)

    input_ids = jax.random.randint(ikey, (BATCH, SEQ), 0, VOCAB, dtype=jnp.int32)
    attention_mask = jnp.ones((BATCH, SEQ), dtype=jnp.int32)
    # make the mask non-trivial: last two tokens of sample 1 are padding
    attention_mask = attention_mask.at[1, SEQ - 2:].set(0)

    cat_logits, sub_logits = multi_output_bert_forward(packed, input_ids, attention_mask)
    jax.block_until_ready((cat_logits, sub_logits))

    assert cat_logits.shape == (BATCH, NUM_CATEGORIES)
    assert sub_logits.shape == (BATCH, NUM_SUBCATEGORIES)
    assert bool(jnp.all(jnp.isfinite(cat_logits))) and bool(jnp.all(jnp.isfinite(sub_logits)))
    print("KERNEL_OK")
</pallas_src>

<mosaic_0001>
module attributes {stable_mosaic.version = 11 : i64} {
  func.func @_fused_bert_kernel(%arg0: i32, %arg1: memref<16x1xi32, #tpu.memory_space<vmem>>, %arg2: memref<1x16xf32, #tpu.memory_space<vmem>>, %arg3: memref<128x32xf32, #tpu.memory_space<vmem>>, %arg4: memref<16x32xf32, #tpu.memory_space<vmem>>, %arg5: memref<384x128xf32, #tpu.memory_space<vmem>>, %arg6: memref<24x128xf32, #tpu.memory_space<vmem>>, %arg7: memref<2x128xf32, #tpu.memory_space<vmem>>) attributes {dimension_semantics = [#tpu.dimension_semantics<arbitrary>], iteration_bounds = array<i64: 1>, scalar_prefetch = 0 : i64, scratch_operands = 0 : i64, tpu.core_type = #tpu.core_type<tc>, window_params = [{pipeline_mode = #tpu.pipeline_mode<synchronous>, transform_indices = @transform_0, window_bounds = array<i64: 16, 1>}, {pipeline_mode = #tpu.pipeline_mode<synchronous>, transform_indices = @transform_1, window_bounds = array<i64: 1, 16>}, {pipeline_mode = #tpu.pipeline_mode<synchronous>, transform_indices = @transform_2, window_bounds = array<i64: 128, 32>}, {pipeline_mode = #tpu.pipeline_mode<synchronous>, transform_indices = @transform_3, window_bounds = array<i64: 16, 32>}, {pipeline_mode = #tpu.pipeline_mode<synchronous>, transform_indices = @transform_4, window_bounds = array<i64: 384, 128>}, {pipeline_mode = #tpu.pipeline_mode<synchronous>, transform_indices = @transform_5, window_bounds = array<i64: 24, 128>}, {pipeline_mode = #tpu.pipeline_mode<synchronous>, transform_indices = @transform_6, window_bounds = array<i64: 2, 128>}]} {
    %c0 = arith.constant 0 : index
    %c0_0 = arith.constant 0 : index
    %0 = vector.load %arg1[%c0, %c0_0] : memref<16x1xi32, #tpu.memory_space<vmem>>, vector<16x1xi32>
    %1 = tpu.iota {dimensions = array<i32: 1>} : vector<16x128xi32>
    %2 = vector.broadcast %0 : vector<16x1xi32> to vector<16x128xi32>
    %3 = arith.cmpi eq, %2, %1 : vector<16x128xi32>
    %4 = arith.extui %3 : vector<16x128xi1> to vector<16x128xi32>
    %5 = arith.sitofp %4 : vector<16x128xi32> to vector<16x128xf32>
    %c0_1 = arith.constant 0 : index
    %c0_2 = arith.constant 0 : index
    %6 = vector.load %arg3[%c0_1, %c0_2] : memref<128x32xf32, #tpu.memory_space<vmem>>, vector<128x32xf32>
    %cst = arith.constant dense<0.000000e+00> : vector<16x32xf32>
    %7 = tpu.matmul %5, %6, %cst {dimension_numbers = #tpu.dot_dimension_numbers<[1], [0], [0], [1], [0, 0, 1, 1], [], []>} : vector<16x128xf32>, vector<128x32xf32>, vector<16x32xf32> -> vector<16x32xf32>
    %c0_3 = arith.constant 0 : index
    %c0_4 = arith.constant 0 : index
    %8 = vector.load %arg4[%c0_3, %c0_4] : memref<16x32xf32, #tpu.memory_space<vmem>>, vector<16x32xf32>
    %9 = arith.addf %7, %8 : vector<16x32xf32>
    %cst_5 = arith.constant dense<0.000000e+00> : vector<16xf32>
    %10 = vector.multi_reduction <add>, %9, %cst_5 [1] : vector<16x32xf32> to vector<16xf32>
    %11 = vector.shape_cast %10 : vector<16xf32> to vector<16x1xf32>
    %cst_6 = arith.constant 3.200000e+01 : f32
    %12 = vector.broadcast %cst_6 : f32 to vector<16x1xf32>
    %13 = arith.divf %11, %12 : vector<16x1xf32>
    %14 = vector.broadcast %13 : vector<16x1xf32> to vector<16x32xf32>
    %15 = arith.subf %9, %14 : vector<16x32xf32>
    %16 = arith.mulf %15, %15 : vector<16x32xf32>
    %cst_7 = arith.constant dense<0.000000e+00> : vector<16xf32>
    %17 = vector.multi_reduction <add>, %16, %cst_7 [1] : vector<16x32xf32> to vector<16xf32>
    %18 = vector.shape_cast %17 : vector<16xf32> to vector<16x1xf32>
    %cst_8 = arith.constant 3.200000e+01 : f32
    %19 = vector.broadcast %cst_8 : f32 to vector<16x1xf32>
    %20 = arith.divf %18, %19 : vector<16x1xf32>
    %21 = vector.broadcast %13 : vector<16x1xf32> to vector<16x32xf32>
    %22 = arith.subf %9, %21 : vector<16x32xf32>
    %cst_9 = arith.constant 9.99999996E-13 : f32
    %23 = vector.broadcast %cst_9 : f32 to vector<16x1xf32>
    %24 = arith.addf %20, %23 : vector<16x1xf32>
    %25 = math.rsqrt %24 : vector<16x1xf32>
    %26 = vector.broadcast %25 : vector<16x1xf32> to vector<16x32xf32>
    %27 = arith.mulf %22, %26 : vector<16x32xf32>
    %c0_10 = arith.constant 0 : index
    %c0_11 = arith.constant 0 : index
    %28 = vector.load %arg6[%c0_10, %c0_11] : memref<24x128xf32, #tpu.memory_space<vmem>>, vector<1x32xf32>
    %29 = vector.broadcast %28 : vector<1x32xf32> to vector<16x32xf32>
    %30 = arith.mulf %27, %29 : vector<16x32xf32>
    %c1 = arith.constant 1 : index
    %c0_12 = arith.constant 0 : index
    %31 = vector.load %arg6[%c1, %c0_12] : memref<24x128xf32, #tpu.memory_space<vmem>>, vector<1x32xf32>
    %32 = vector.broadcast %31 : vector<1x32xf32> to vector<16x32xf32>
    %33 = arith.addf %30, %32 : vector<16x32xf32>
    %34 = tpu.iota {dimensions = array<i32: 0>} : vector<16x16xi32>
    %c3_i32 = arith.constant 3 : i32
    %35 = vector.broadcast %c3_i32 : i32 to vector<16x16xi32>
    %36 = arith.shrui %34, %35 : vector<16x16xi32>
    %37 = tpu.iota {dimensions = array<i32: 1>} : vector<16x16xi32>
    %c3_i32_13 = arith.constant 3 : i32
    %38 = vector.broadcast %c3_i32_13 : i32 to vector<16x16xi32>
    %39 = arith.shrui %37, %38 : vector<16x16xi32>
    %40 = arith.cmpi eq, %36, %39 : vector<16x16xi32>
    %cst_14 = arith.constant 0.000000e+00 : f32
    %cst_15 = arith.constant -1.000000e+09 : f32
    %41 = vector.broadcast %cst_14 : f32 to vector<16x16xf32>
    %42 = vector.broadcast %cst_15 : f32 to vector<16x16xf32>
    %43 = arith.select %40, %41, %42 : vector<16x16xi1>, vector<16x16xf32>
    %c0_16 = arith.constant 0 : index
    %c0_17 = arith.constant 0 : index
    %44 = vector.load %arg2[%c0_16, %c0_17] : memref<1x16xf32, #tpu.memory_space<vmem>>, vector<1x16xf32>
    %45 = vector.broadcast %44 : vector<1x16xf32> to vector<16x16xf32>
    %46 = arith.addf %43, %45 : vector<16x16xf32>
    %c0_18 = arith.constant 0 : index
    %c0_19 = arith.constant 0 : index
    %47 = vector.load %arg5[%c0_18, %c0_19] : memref<384x128xf32, #tpu.memory_space<vmem>>, vector<32x96xf32>
    %c32 = arith.constant 32 : index
    %c0_20 = arith.constant 0 : index
    %48 = vector.load %arg5[%c32, %c0_20] : memref<384x128xf32, #tpu.memory_space<vmem>>, vector<32x32xf32>
    %c64 = arith.constant 64 : index
    %c0_21 = arith.constant 0 : index
    %49 = vector.load %arg5[%c64, %c0_21] : memref<384x128xf32, #tpu.memory_space<vmem>>, vector<32x64xf32>
    %c96 = arith.constant 96 : index
    %c0_22 = arith.constant 0 : index
    %50 = vector.load %arg5[%c96, %c0_22] : memref<384x128xf32, #tpu.memory_space<vmem>>, vector<64x32xf32>
    %cst_23 = arith.constant dense<0.000000e+00> : vector<16x96xf32>
    %51 = tpu.matmul %33, %47, %cst_23 {dimension_numbers = #tpu.dot_dimension_numbers<[1], [0], [0], [1], [0, 0, 1, 1], [], []>} : vector<16x32xf32>, vector<32x96xf32>, vector<16x96xf32> -> vector<16x96xf32>
    %c2 = arith.constant 2 : index
    %c0_24 = arith.constant 0 : index
    %52 = vector.load %arg6[%c2, %c0_24] : memref<24x128xf32, #tpu.memory_space<vmem>>, vector<1x96xf32>
    %53 = vector.broadcast %52 : vector<1x96xf32> to vector<16x96xf32>
    %54 = arith.addf %51, %53 : vector<16x96xf32>
    %55 = vector.extract_strided_slice %54 {offsets = [0, 0], sizes = [16, 16], strides = [1, 1]} : vector<16x96xf32> to vector<16x16xf32>
    %56 = vector.extract_strided_slice %54 {offsets = [0, 32], sizes = [16, 16], strides = [1, 1]} : vector<16x96xf32> to vector<16x16xf32>
    %57 = vector.extract_strided_slice %54 {offsets = [0, 64], sizes = [16, 16], strides = [1, 1]} : vector<16x96xf32> to vector<16x16xf32>
    %cst_25 = arith.constant dense<0.000000e+00> : vector<16x16xf32>
    %58 = tpu.matmul %55, %56, %cst_25 {dimension_numbers = #tpu.dot_dimension_numbers<[1], [1], [0], [0], [0, 0, 1, 0], [], []>} : vector<16x16xf32>, vector<16x16xf32>, vector<16x16xf32> -> vector<16x16xf32>
    %cst_26 = arith.constant 2.500000e-01 : f32
    %59 = vector.broadcast %cst_26 : f32 to vector<16x16xf32>
    %60 = arith.mulf %58, %59 : vector<16x16xf32>
    %61 = arith.addf %60, %46 : vector<16x16xf32>
    %cst_27 = arith.constant dense<0xFF800000> : vector<16xf32>
    %62 = vector.multi_reduction <maximumf>, %61, %cst_27 [1] : vector<16x16xf32> to vector<16xf32>
    %63 = vector.shape_cast %62 : vector<16xf32> to vector<16x1xf32>
    %64 = vector.broadcast %63 : vector<16x1xf32> to vector<16x16xf32>
    %65 = arith.subf %61, %64 : vector<16x16xf32>
    %66 = math.exp %65 : vector<16x16xf32>
    %cst_28 = arith.constant dense<0.000000e+00> : vector<16xf32>
    %67 = vector.multi_reduction <add>, %66, %cst_28 [1] : vector<16x16xf32> to vector<16xf32>
    %68 = vector.shape_cast %67 : vector<16xf32> to vector<16x1xf32>
    %69 = vector.broadcast %68 : vector<16x1xf32> to vector<16x16xf32>
    %70 = arith.divf %66, %69 : vector<16x16xf32>
    %cst_29 = arith.constant dense<0.000000e+00> : vector<16x16xf32>
    %71 = tpu.matmul %70, %57, %cst_29 {dimension_numbers = #tpu.dot_dimension_numbers<[1], [0], [0], [1], [0, 0, 1, 1], [], []>} : vector<16x16xf32>, vector<16x16xf32>, vector<16x16xf32> -> vector<16x16xf32>
    %72 = vector.extract_strided_slice %54 {offsets = [0, 16], sizes = [16, 16], strides = [1, 1]} : vector<16x96xf32> to vector<16x16xf32>
    %73 = vector.extract_strided_slice %54 {offsets = [0, 48], sizes = [16, 16], strides = [1, 1]} : vector<16x96xf32> to vector<16x16xf32>
    %74 = vector.extract_strided_slice %54 {offsets = [0, 80], sizes = [16, 16], strides = [1, 1]} : vector<16x96xf32> to vector<16x16xf32>
    %cst_30 = arith.constant dense<0.000000e+00> : vector<16x16xf32>
    %75 = tpu.matmul %72, %73, %cst_30 {dimension_numbers = #tpu.dot_dimension_numbers<[1], [1], [0], [0], [0, 0, 1, 0], [], []>} : vector<16x16xf32>, vector<16x16xf32>, vector<16x16xf32> -> vector<16x16xf32>
    %cst_31 = arith.constant 2.500000e-01 : f32
    %76 = vector.broadcast %cst_31 : f32 to vector<16x16xf32>
    %77 = arith.mulf %75, %76 : vector<16x16xf32>
    %78 = arith.addf %77, %46 : vector<16x16xf32>
    %cst_32 = arith.constant dense<0xFF800000> : vector<16xf32>
    %79 = vector.multi_reduction <maximumf>, %78, %cst_32 [1] : vector<16x16xf32> to vector<16xf32>
    %80 = vector.shape_cast %79 : vector<16xf32> to vector<16x1xf32>
    %81 = vector.broadcast %80 : vector<16x1xf32> to vector<16x16xf32>
    %82 = arith.subf %78, %81 : vector<16x16xf32>
    %83 = math.exp %82 : vector<16x16xf32>
    %cst_33 = arith.constant dense<0.000000e+00> : vector<16xf32>
    %84 = vector.multi_reduction <add>, %83, %cst_33 [1] : vector<16x16xf32> to vector<16xf32>
    %85 = vector.shape_cast %84 : vector<16xf32> to vector<16x1xf32>
    %86 = vector.broadcast %85 : vector<16x1xf32> to vector<16x16xf32>
    %87 = arith.divf %83, %86 : vector<16x16xf32>
    %cst_34 = arith.constant dense<0.000000e+00> : vector<16x16xf32>
    %88 = tpu.matmul %87, %74, %cst_34 {dimension_numbers = #tpu.dot_dimension_numbers<[1], [0], [0], [1], [0, 0, 1, 1], [], []>} : vector<16x16xf32>, vector<16x16xf32>, vector<16x16xf32> -> vector<16x16xf32>
    %89 = tpu.concatenate %71, %88 in 1 : vector<16x16xf32>, vector<16x16xf32> -> vector<16x32xf32>
    %cst_35 = arith.constant dense<0.000000e+00> : vector<16x32xf32>
    %90 = tpu.matmul %89, %48, %cst_35 {dimension_numbers = #tpu.dot_dimension_numbers<[1], [0], [0], [1], [0, 0, 1, 1], [], []>} : vector<16x32xf32>, vector<32x32xf32>, vector<16x32xf32> -> vector<16x32xf32>
    %c3 = arith.constant 3 : index
    %c0_36 = arith.constant 0 : index
    %91 = vector.load %arg6[%c3, %c0_36] : memref<24x128xf32, #tpu.memory_space<vmem>>, vector<1x32xf32>
    %92 = vector.broadcast %91 : vector<1x32xf32> to vector<16x32xf32>
    %93 = arith.addf %90, %92 : vector<16x32xf32>
    %94 = arith.addf %93, %33 : vector<16x32xf32>
    %cst_37 = arith.constant dense<0.000000e+00> : vector<16xf32>
    %95 = vector.multi_reduction <add>, %94, %cst_37 [1] : vector<16x32xf32> to vector<16xf32>
    %96 = vector.shape_cast %95 : vector<16xf32> to vector<16x1xf32>
    %cst_38 = arith.constant 3.200000e+01 : f32
    %97 = vector.broadcast %cst_38 : f32 to vector<16x1xf32>
    %98 = arith.divf %96, %97 : vector<16x1xf32>
    %99 = vector.broadcast %98 : vector<16x1xf32> to vector<16x32xf32>
    %100 = arith.subf %94, %99 : vector<16x32xf32>
    %101 = arith.mulf %100, %100 : vector<16x32xf32>
    %cst_39 = arith.constant dense<0.000000e+00> : vector<16xf32>
    %102 = vector.multi_reduction <add>, %101, %cst_39 [1] : vector<16x32xf32> to vector<16xf32>
    %103 = vector.shape_cast %102 : vector<16xf32> to vector<16x1xf32>
    %cst_40 = arith.constant 3.200000e+01 : f32
    %104 = vector.broadcast %cst_40 : f32 to vector<16x1xf32>
    %105 = arith.divf %103, %104 : vector<16x1xf32>
    %106 = vector.broadcast %98 : vector<16x1xf32> to vector<16x32xf32>
    %107 = arith.subf %94, %106 : vector<16x32xf32>
    %cst_41 = arith.constant 9.99999996E-13 : f32
    %108 = vector.broadcast %cst_41 : f32 to vector<16x1xf32>
    %109 = arith.addf %105, %108 : vector<16x1xf32>
    %110 = math.rsqrt %109 : vector<16x1xf32>
    %111 = vector.broadcast %110 : vector<16x1xf32> to vector<16x32xf32>
    %112 = arith.mulf %107, %111 : vector<16x32xf32>
    %c4 = arith.constant 4 : index
    %c0_42 = arith.constant 0 : index
    %113 = vector.load %arg6[%c4, %c0_42] : memref<24x128xf32, #tpu.memory_space<vmem>>, vector<1x32xf32>
    %114 = vector.broadcast %113 : vector<1x32xf32> to vector<16x32xf32>
    %115 = arith.mulf %112, %114 : vector<16x32xf32>
    %c5 = arith.constant 5 : index
    %c0_43 = arith.constant 0 : index
    %116 = vector.load %arg6[%c5, %c0_43] : memref<24x128xf32, #tpu.memory_space<vmem>>, vector<1x32xf32>
    %117 = vector.broadcast %116 : vector<1x32xf32> to vector<16x32xf32>
    %118 = arith.addf %115, %117 : vector<16x32xf32>
    %cst_44 = arith.constant dense<0.000000e+00> : vector<16x64xf32>
    %119 = tpu.matmul %118, %49, %cst_44 {dimension_numbers = #tpu.dot_dimension_numbers<[1], [0], [0], [1], [0, 0, 1, 1], [], []>} : vector<16x32xf32>, vector<32x64xf32>, vector<16x64xf32> -> vector<16x64xf32>
    %c6 = arith.constant 6 : index
    %c0_45 = arith.constant 0 : index
    %120 = vector.load %arg6[%c6, %c0_45] : memref<24x128xf32, #tpu.memory_space<vmem>>, vector<1x64xf32>
    %121 = vector.broadcast %120 : vector<1x64xf32> to vector<16x64xf32>
    %122 = arith.addf %119, %121 : vector<16x64xf32>
    %cst_46 = arith.constant 5.000000e-01 : f32
    %123 = vector.broadcast %cst_46 : f32 to vector<16x64xf32>
    %124 = arith.mulf %123, %122 : vector<16x64xf32>
    %cst_47 = arith.constant 4.471500e-02 : f32
    %125 = vector.broadcast %cst_47 : f32 to vector<16x64xf32>
    %126 = arith.mulf %125, %122 : vector<16x64xf32>
    %127 = arith.mulf %126, %122 : vector<16x64xf32>
    %128 = arith.mulf %127, %122 : vector<16x64xf32>
    %129 = arith.addf %122, %128 : vector<16x64xf32>
    %cst_48 = arith.constant 0.797884583 : f32
    %130 = vector.broadcast %cst_48 : f32 to vector<16x64xf32>
    %131 = arith.mulf %130, %129 : vector<16x64xf32>
    %132 = math.tanh %131 : vector<16x64xf32>
    %cst_49 = arith.constant 1.000000e+00 : f32
    %133 = vector.broadcast %cst_49 : f32 to vector<16x64xf32>
    %134 = arith.addf %133, %132 : vector<16x64xf32>
    %135 = arith.mulf %124, %134 : vector<16x64xf32>
    %cst_50 = arith.constant dense<0.000000e+00> : vector<16x32xf32>
    %136 = tpu.matmul %135, %50, %cst_50 {dimension_numbers = #tpu.dot_dimension_numbers<[1], [0], [0], [1], [0, 0, 1, 1], [], []>} : vector<16x64xf32>, vector<64x32xf32>, vector<16x32xf32> -> vector<16x32xf32>
    %c7 = arith.constant 7 : index
    %c0_51 = arith.constant 0 : index
    %137 = vector.load %arg6[%c7, %c0_51] : memref<24x128xf32, #tpu.memory_space<vmem>>, vector<1x32xf32>
    %138 = vector.broadcast %137 : vector<1x32xf32> to vector<16x32xf32>
    %139 = arith.addf %136, %138 : vector<16x32xf32>
    %140 = arith.addf %139, %118 : vector<16x32xf32>
    %cst_52 = arith.constant dense<0.000000e+00> : vector<16xf32>
    %141 = vector.multi_reduction <add>, %140, %cst_52 [1] : vector<16x32xf32> to vector<16xf32>
    %142 = vector.shape_cast %141 : vector<16xf32> to vector<16x1xf32>
    %cst_53 = arith.constant 3.200000e+01 : f32
    %143 = vector.broadcast %cst_53 : f32 to vector<16x1xf32>
    %144 = arith.divf %142, %143 : vector<16x1xf32>
    %145 = vector.broadcast %144 : vector<16x1xf32> to vector<16x32xf32>
    %146 = arith.subf %140, %145 : vector<16x32xf32>
    %147 = arith.mulf %146, %146 : vector<16x32xf32>
    %cst_54 = arith.constant dense<0.000000e+00> : vector<16xf32>
    %148 = vector.multi_reduction <add>, %147, %cst_54 [1] : vector<16x32xf32> to vector<16xf32>
    %149 = vector.shape_cast %148 : vector<16xf32> to vector<16x1xf32>
    %cst_55 = arith.constant 3.200000e+01 : f32
    %150 = vector.broadcast %cst_55 : f32 to vector<16x1xf32>
    %151 = arith.divf %149, %150 : vector<16x1xf32>
    %152 = vector.broadcast %144 : vector<16x1xf32> to vector<16x32xf32>
    %153 = arith.subf %140, %152 : vector<16x32xf32>
    %cst_56 = arith.constant 9.99999996E-13 : f32
    %154 = vector.broadcast %cst_56 : f32 to vector<16x1xf32>
    %155 = arith.addf %151, %154 : vector<16x1xf32>
    %156 = math.rsqrt %155 : vector<16x1xf32>
    %157 = vector.broadcast %156 : vector<16x1xf32> to vector<16x32xf32>
    %158 = arith.mulf %153, %157 : vector<16x32xf32>
    %c8 = arith.constant 8 : index
    %c0_57 = arith.constant 0 : index
    %159 = vector.load %arg6[%c8, %c0_57] : memref<24x128xf32, #tpu.memory_space<vmem>>, vector<1x32xf32>
    %160 = vector.broadcast %159 : vector<1x32xf32> to vector<16x32xf32>
    %161 = arith.mulf %158, %160 : vector<16x32xf32>
    %c9 = arith.constant 9 : index
    %c0_58 = arith.constant 0 : index
    %162 = vector.load %arg6[%c9, %c0_58] : memref<24x128xf32, #tpu.memory_space<vmem>>, vector<1x32xf32>
    %163 = vector.broadcast %162 : vector<1x32xf32> to vector<16x32xf32>
    %164 = arith.addf %161, %163 : vector<16x32xf32>
    %c160 = arith.constant 160 : index
    %c0_59 = arith.constant 0 : index
    %165 = vector.load %arg5[%c160, %c0_59] : memref<384x128xf32, #tpu.memory_space<vmem>>, vector<32x96xf32>
    %c192 = arith.constant 192 : index
    %c0_60 = arith.constant 0 : index
    %166 = vector.load %arg5[%c192, %c0_60] : memref<384x128xf32, #tpu.memory_space<vmem>>, vector<32x32xf32>
    %c224 = arith.constant 224 : index
    %c0_61 = arith.constant 0 : index
    %167 = vector.load %arg5[%c224, %c0_61] : memref<384x128xf32, #tpu.memory_space<vmem>>, vector<32x64xf32>
    %c256 = arith.constant 256 : index
    %c0_62 = arith.constant 0 : index
    %168 = vector.load %arg5[%c256, %c0_62] : memref<384x128xf32, #tpu.memory_space<vmem>>, vector<64x32xf32>
    %cst_63 = arith.constant dense<0.000000e+00> : vector<16x96xf32>
    %169 = tpu.matmul %164, %165, %cst_63 {dimension_numbers = #tpu.dot_dimension_numbers<[1], [0], [0], [1], [0, 0, 1, 1], [], []>} : vector<16x32xf32>, vector<32x96xf32>, vector<16x96xf32> -> vector<16x96xf32>
    %c10 = arith.constant 10 : index
    %c0_64 = arith.constant 0 : index
    %170 = vector.load %arg6[%c10, %c0_64] : memref<24x128xf32, #tpu.memory_space<vmem>>, vector<1x96xf32>
    %171 = vector.broadcast %170 : vector<1x96xf32> to vector<16x96xf32>
    %172 = arith.addf %169, %171 : vector<16x96xf32>
    %173 = vector.extract_strided_slice %172 {offsets = [0, 0], sizes = [16, 16], strides = [1, 1]} : vector<16x96xf32> to vector<16x16xf32>
    %174 = vector.extract_strided_slice %172 {offsets = [0, 32], sizes = [16, 16], strides = [1, 1]} : vector<16x96xf32> to vector<16x16xf32>
    %175 = vector.extract_strided_slice %172 {offsets = [0, 64], sizes = [16, 16], strides = [1, 1]} : vector<16x96xf32> to vector<16x16xf32>
    %cst_65 = arith.constant dense<0.000000e+00> : vector<16x16xf32>
    %176 = tpu.matmul %173, %174, %cst_65 {dimension_numbers = #tpu.dot_dimension_numbers<[1], [1], [0], [0], [0, 0, 1, 0], [], []>} : vector<16x16xf32>, vector<16x16xf32>, vector<16x16xf32> -> vector<16x16xf32>
    %cst_66 = arith.constant 2.500000e-01 : f32
    %177 = vector.broadcast %cst_66 : f32 to vector<16x16xf32>
    %178 = arith.mulf %176, %177 : vector<16x16xf32>
    %179 = arith.addf %178, %46 : vector<16x16xf32>
    %cst_67 = arith.constant dense<0xFF800000> : vector<16xf32>
    %180 = vector.multi_reduction <maximumf>, %179, %cst_67 [1] : vector<16x16xf32> to vector<16xf32>
    %181 = vector.shape_cast %180 : vector<16xf32> to vector<16x1xf32>
    %182 = vector.broadcast %181 : vector<16x1xf32> to vector<16x16xf32>
    %183 = arith.subf %179, %182 : vector<16x16xf32>
    %184 = math.exp %183 : vector<16x16xf32>
    %cst_68 = arith.constant dense<0.000000e+00> : vector<16xf32>
    %185 = vector.multi_reduction <add>, %184, %cst_68 [1] : vector<16x16xf32> to vector<16xf32>
    %186 = vector.shape_cast %185 : vector<16xf32> to vector<16x1xf32>
    %187 = vector.broadcast %186 : vector<16x1xf32> to vector<16x16xf32>
    %188 = arith.divf %184, %187 : vector<16x16xf32>
    %cst_69 = arith.constant dense<0.000000e+00> : vector<16x16xf32>
    %189 = tpu.matmul %188, %175, %cst_69 {dimension_numbers = #tpu.dot_dimension_numbers<[1], [0], [0], [1], [0, 0, 1, 1], [], []>} : vector<16x16xf32>, vector<16x16xf32>, vector<16x16xf32> -> vector<16x16xf32>
    %190 = vector.extract_strided_slice %172 {offsets = [0, 16], sizes = [16, 16], strides = [1, 1]} : vector<16x96xf32> to vector<16x16xf32>
    %191 = vector.extract_strided_slice %172 {offsets = [0, 48], sizes = [16, 16], strides = [1, 1]} : vector<16x96xf32> to vector<16x16xf32>
    %192 = vector.extract_strided_slice %172 {offsets = [0, 80], sizes = [16, 16], strides = [1, 1]} : vector<16x96xf32> to vector<16x16xf32>
    %cst_70 = arith.constant dense<0.000000e+00> : vector<16x16xf32>
    %193 = tpu.matmul %190, %191, %cst_70 {dimension_numbers = #tpu.dot_dimension_numbers<[1], [1], [0], [0], [0, 0, 1, 0], [], []>} : vector<16x16xf32>, vector<16x16xf32>, vector<16x16xf32> -> vector<16x16xf32>
    %cst_71 = arith.constant 2.500000e-01 : f32
    %194 = vector.broadcast %cst_71 : f32 to vector<16x16xf32>
    %195 = arith.mulf %193, %194 : vector<16x16xf32>
    %196 = arith.addf %195, %46 : vector<16x16xf32>
    %cst_72 = arith.constant dense<0xFF800000> : vector<16xf32>
    %197 = vector.multi_reduction <maximumf>, %196, %cst_72 [1] : vector<16x16xf32> to vector<16xf32>
    %198 = vector.shape_cast %197 : vector<16xf32> to vector<16x1xf32>
    %199 = vector.broadcast %198 : vector<16x1xf32> to vector<16x16xf32>
    %200 = arith.subf %196, %199 : vector<16x16xf32>
    %201 = math.exp %200 : vector<16x16xf32>
    %cst_73 = arith.constant dense<0.000000e+00> : vector<16xf32>
    %202 = vector.multi_reduction <add>, %201, %cst_73 [1] : vector<16x16xf32> to vector<16xf32>
    %203 = vector.shape_cast %202 : vector<16xf32> to vector<16x1xf32>
    %204 = vector.broadcast %203 : vector<16x1xf32> to vector<16x16xf32>
    %205 = arith.divf %201, %204 : vector<16x16xf32>
    %cst_74 = arith.constant dense<0.000000e+00> : vector<16x16xf32>
    %206 = tpu.matmul %205, %192, %cst_74 {dimension_numbers = #tpu.dot_dimension_numbers<[1], [0], [0], [1], [0, 0, 1, 1], [], []>} : vector<16x16xf32>, vector<16x16xf32>, vector<16x16xf32> -> vector<16x16xf32>
    %207 = tpu.concatenate %189, %206 in 1 : vector<16x16xf32>, vector<16x16xf32> -> vector<16x32xf32>
    %cst_75 = arith.constant dense<0.000000e+00> : vector<16x32xf32>
    %208 = tpu.matmul %207, %166, %cst_75 {dimension_numbers = #tpu.dot_dimension_numbers<[1], [0], [0], [1], [0, 0, 1, 1], [], []>} : vector<16x32xf32>, vector<32x32xf32>, vector<16x32xf32> -> vector<16x32xf32>
    %c11 = arith.constant 11 : index
    %c0_76 = arith.constant 0 : index
    %209 = vector.load %arg6[%c11, %c0_76] : memref<24x128xf32, #tpu.memory_space<vmem>>, vector<1x32xf32>
    %210 = vector.broadcast %209 : vector<1x32xf32> to vector<16x32xf32>
    %211 = arith.addf %208, %210 : vector<16x32xf32>
    %212 = arith.addf %211, %164 : vector<16x32xf32>
    %cst_77 = arith.constant dense<0.000000e+00> : vector<16xf32>
    %213 = vector.multi_reduction <add>, %212, %cst_77 [1] : vector<16x32xf32> to vector<16xf32>
    %214 = vector.shape_cast %213 : vector<16xf32> to vector<16x1xf32>
    %cst_78 = arith.constant 3.200000e+01 : f32
    %215 = vector.broadcast %cst_78 : f32 to vector<16x1xf32>
    %216 = arith.divf %214, %215 : vector<16x1xf32>
    %217 = vector.broadcast %216 : vector<16x1xf32> to vector<16x32xf32>
    %218 = arith.subf %212, %217 : vector<16x32xf32>
    %219 = arith.mulf %218, %218 : vector<16x32xf32>
    %cst_79 = arith.constant dense<0.000000e+00> : vector<16xf32>
    %220 = vector.multi_reduction <add>, %219, %cst_79 [1] : vector<16x32xf32> to vector<16xf32>
    %221 = vector.shape_cast %220 : vector<16xf32> to vector<16x1xf32>
    %cst_80 = arith.constant 3.200000e+01 : f32
    %222 = vector.broadcast %cst_80 : f32 to vector<16x1xf32>
    %223 = arith.divf %221, %222 : vector<16x1xf32>
    %224 = vector.broadcast %216 : vector<16x1xf32> to vector<16x32xf32>
    %225 = arith.subf %212, %224 : vector<16x32xf32>
    %cst_81 = arith.constant 9.99999996E-13 : f32
    %226 = vector.broadcast %cst_81 : f32 to vector<16x1xf32>
    %227 = arith.addf %223, %226 : vector<16x1xf32>
    %228 = math.rsqrt %227 : vector<16x1xf32>
    %229 = vector.broadcast %228 : vector<16x1xf32> to vector<16x32xf32>
    %230 = arith.mulf %225, %229 : vector<16x32xf32>
    %c12 = arith.constant 12 : index
    %c0_82 = arith.constant 0 : index
    %231 = vector.load %arg6[%c12, %c0_82] : memref<24x128xf32, #tpu.memory_space<vmem>>, vector<1x32xf32>
    %232 = vector.broadcast %231 : vector<1x32xf32> to vector<16x32xf32>
    %233 = arith.mulf %230, %232 : vector<16x32xf32>
    %c13 = arith.constant 13 : index
    %c0_83 = arith.constant 0 : index
    %234 = vector.load %arg6[%c13, %c0_83] : memref<24x128xf32, #tpu.memory_space<vmem>>, vector<1x32xf32>
    %235 = vector.broadcast %234 : vector<1x32xf32> to vector<16x32xf32>
    %236 = arith.addf %233, %235 : vector<16x32xf32>
    %cst_84 = arith.constant dense<0.000000e+00> : vector<16x64xf32>
    %237 = tpu.matmul %236, %167, %cst_84 {dimension_numbers = #tpu.dot_dimension_numbers<[1], [0], [0], [1], [0, 0, 1, 1], [], []>} : vector<16x32xf32>, vector<32x64xf32>, vector<16x64xf32> -> vector<16x64xf32>
    %c14 = arith.constant 14 : index
    %c0_85 = arith.constant 0 : index
    %238 = vector.load %arg6[%c14, %c0_85] : memref<24x128xf32, #tpu.memory_space<vmem>>, vector<1x64xf32>
    %239 = vector.broadcast %238 : vector<1x64xf32> to vector<16x64xf32>
    %240 = arith.addf %237, %239 : vector<16x64xf32>
    %cst_86 = arith.constant 5.000000e-01 : f32
    %241 = vector.broadcast %cst_86 : f32 to vector<16x64xf32>
    %242 = arith.mulf %241, %240 : vector<16x64xf32>
    %cst_87 = arith.constant 4.471500e-02 : f32
    %243 = vector.broadcast %cst_87 : f32 to vector<16x64xf32>
    %244 = arith.mulf %243, %240 : vector<16x64xf32>
    %245 = arith.mulf %244, %240 : vector<16x64xf32>
    %246 = arith.mulf %245, %240 : vector<16x64xf32>
    %247 = arith.addf %240, %246 : vector<16x64xf32>
    %cst_88 = arith.constant 0.797884583 : f32
    %248 = vector.broadcast %cst_88 : f32 to vector<16x64xf32>
    %249 = arith.mulf %248, %247 : vector<16x64xf32>
    %250 = math.tanh %249 : vector<16x64xf32>
    %cst_89 = arith.constant 1.000000e+00 : f32
    %251 = vector.broadcast %cst_89 : f32 to vector<16x64xf32>
    %252 = arith.addf %251, %250 : vector<16x64xf32>
    %253 = arith.mulf %242, %252 : vector<16x64xf32>
    %cst_90 = arith.constant dense<0.000000e+00> : vector<16x32xf32>
    %254 = tpu.matmul %253, %168, %cst_90 {dimension_numbers = #tpu.dot_dimension_numbers<[1], [0], [0], [1], [0, 0, 1, 1], [], []>} : vector<16x64xf32>, vector<64x32xf32>, vector<16x32xf32> -> vector<16x32xf32>
    %c15 = arith.constant 15 : index
    %c0_91 = arith.constant 0 : index
    %255 = vector.load %arg6[%c15, %c0_91] : memref<24x128xf32, #tpu.memory_space<vmem>>, vector<1x32xf32>
    %256 = vector.broadcast %255 : vector<1x32xf32> to vector<16x32xf32>
    %257 = arith.addf %254, %256 : vector<16x32xf32>
    %258 = arith.addf %257, %236 : vector<16x32xf32>
    %cst_92 = arith.constant dense<0.000000e+00> : vector<16xf32>
    %259 = vector.multi_reduction <add>, %258, %cst_92 [1] : vector<16x32xf32> to vector<16xf32>
    %260 = vector.shape_cast %259 : vector<16xf32> to vector<16x1xf32>
    %cst_93 = arith.constant 3.200000e+01 : f32
    %261 = vector.broadcast %cst_93 : f32 to vector<16x1xf32>
    %262 = arith.divf %260, %261 : vector<16x1xf32>
    %263 = vector.broadcast %262 : vector<16x1xf32> to vector<16x32xf32>
    %264 = arith.subf %258, %263 : vector<16x32xf32>
    %265 = arith.mulf %264, %264 : vector<16x32xf32>
    %cst_94 = arith.constant dense<0.000000e+00> : vector<16xf32>
    %266 = vector.multi_reduction <add>, %265, %cst_94 [1] : vector<16x32xf32> to vector<16xf32>
    %267 = vector.shape_cast %266 : vector<16xf32> to vector<16x1xf32>
    %cst_95 = arith.constant 3.200000e+01 : f32
    %268 = vector.broadcast %cst_95 : f32 to vector<16x1xf32>
    %269 = arith.divf %267, %268 : vector<16x1xf32>
    %270 = vector.broadcast %262 : vector<16x1xf32> to vector<16x32xf32>
    %271 = arith.subf %258, %270 : vector<16x32xf32>
    %cst_96 = arith.constant 9.99999996E-13 : f32
    %272 = vector.broadcast %cst_96 : f32 to vector<16x1xf32>
    %273 = arith.addf %269, %272 : vector<16x1xf32>
    %274 = math.rsqrt %273 : vector<16x1xf32>
    %275 = vector.broadcast %274 : vector<16x1xf32> to vector<16x32xf32>
    %276 = arith.mulf %271, %275 : vector<16x32xf32>
    %c16 = arith.constant 16 : index
    %c0_97 = arith.constant 0 : index
    %277 = vector.load %arg6[%c16, %c0_97] : memref<24x128xf32, #tpu.memory_space<vmem>>, vector<1x32xf32>
    %278 = vector.broadcast %277 : vector<1x32xf32> to vector<16x32xf32>
    %279 = arith.mulf %276, %278 : vector<16x32xf32>
    %c17 = arith.constant 17 : index
    %c0_98 = arith.constant 0 : index
    %280 = vector.load %arg6[%c17, %c0_98] : memref<24x128xf32, #tpu.memory_space<vmem>>, vector<1x32xf32>
    %281 = vector.broadcast %280 : vector<1x32xf32> to vector<16x32xf32>
    %282 = arith.addf %279, %281 : vector<16x32xf32>
    %c320 = arith.constant 320 : index
    %c0_99 = arith.constant 0 : index
    %283 = vector.load %arg5[%c320, %c0_99] : memref<384x128xf32, #tpu.memory_space<vmem>>, vector<32x32xf32>
    %c352 = arith.constant 352 : index
    %c0_100 = arith.constant 0 : index
    %284 = vector.load %arg5[%c352, %c0_100] : memref<384x128xf32, #tpu.memory_space<vmem>>, vector<32x128xf32>
    %285 = vector.extract_strided_slice %282 {offsets = [0, 0], sizes = [1, 32], strides = [1, 1]} : vector<16x32xf32> to vector<1x32xf32>
    %286 = vector.extract_strided_slice %282 {offsets = [8, 0], sizes = [1, 32], strides = [1, 1]} : vector<16x32xf32> to vector<1x32xf32>
    %287 = tpu.concatenate %285, %286 in 0 : vector<1x32xf32>, vector<1x32xf32> -> vector<2x32xf32>
    %cst_101 = arith.constant dense<0.000000e+00> : vector<2x32xf32>
    %288 = tpu.matmul %287, %283, %cst_101 {dimension_numbers = #tpu.dot_dimension_numbers<[1], [0], [0], [1], [0, 0, 1, 1], [], []>} : vector<2x32xf32>, vector<32x32xf32>, vector<2x32xf32> -> vector<2x32xf32>
    %c18 = arith.constant 18 : index
    %c0_102 = arith.constant 0 : index
    %289 = vector.load %arg6[%c18, %c0_102] : memref<24x128xf32, #tpu.memory_space<vmem>>, vector<1x32xf32>
    %290 = vector.broadcast %289 : vector<1x32xf32> to vector<2x32xf32>
    %291 = arith.addf %288, %290 : vector<2x32xf32>
    %292 = math.tanh %291 : vector<2x32xf32>
    %cst_103 = arith.constant dense<0.000000e+00> : vector<2x128xf32>
    %293 = tpu.matmul %292, %284, %cst_103 {dimension_numbers = #tpu.dot_dimension_numbers<[1], [0], [0], [1], [0, 0, 1, 1], [], []>} : vector<2x32xf32>, vector<32x128xf32>, vector<2x128xf32> -> vector<2x128xf32>
    %c19 = arith.constant 19 : index
    %c0_104 = arith.constant 0 : index
    %294 = vector.load %arg6[%c19, %c0_104] : memref<24x128xf32, #tpu.memory_space<vmem>>, vector<1x128xf32>
    %295 = vector.broadcast %294 : vector<1x128xf32> to vector<2x128xf32>
    %296 = arith.addf %293, %295 : vector<2x128xf32>
    %c0_105 = arith.constant 0 : index
    %c0_106 = arith.constant 0 : index
    %297 = vector.load %arg7[%c0_105, %c0_106] : memref<2x128xf32, #tpu.memory_space<vmem>>, vector<2x128xf32>
    tpu.vector_store %arg7[%c0_105, %c0_106], %296 {strides = array<i32>} : memref<2x128xf32, #tpu.memory_space<vmem>>, vector<2x128xf32>,
    return
  }
  func.func @transform_0(%arg0: i32) -> (i32, i32) {
    %c0_i32 = arith.constant 0 : i32
    %c0_i32_0 = arith.constant 0 : i32
    %c0_i32_1 = arith.constant 0 : i32
    return %c0_i32, %c0_i32_0 : i32, i32
  }
  func.func @transform_1(%arg0: i32) -> (i32, i32) {
    %c0_i32 = arith.constant 0 : i32
    %c0_i32_0 = arith.constant 0 : i32
    %c0_i32_1 = arith.constant 0 : i32
    return %c0_i32, %c0_i32_0 : i32, i32
  }
  func.func @transform_2(%arg0: i32) -> (i32, i32) {
    %c0_i32 = arith.constant 0 : i32
    %c0_i32_0 = arith.constant 0 : i32
    %c0_i32_1 = arith.constant 0 : i32
    return %c0_i32, %c0_i32_0 : i32, i32
  }
  func.func @transform_3(%arg0: i32) -> (i32, i32) {
    %c0_i32 = arith.constant 0 : i32
    %c0_i32_0 = arith.constant 0 : i32
    %c0_i32_1 = arith.constant 0 : i32
    return %c0_i32, %c0_i32_0 : i32, i32
  }
  func.func @transform_4(%arg0: i32) -> (i32, i32) {
    %c0_i32 = arith.constant 0 : i32
    %c0_i32_0 = arith.constant 0 : i32
    %c0_i32_1 = arith.constant 0 : i32
    return %c0_i32, %c0_i32_0 : i32, i32
  }
  func.func @transform_5(%arg0: i32) -> (i32, i32) {
    %c0_i32 = arith.constant 0 : i32
    %c0_i32_0 = arith.constant 0 : i32
    %c0_i32_1 = arith.constant 0 : i32
    return %c0_i32, %c0_i32_0 : i32, i32
  }
  func.func @transform_6(%arg0: i32) -> (i32, i32) {
    %c0_i32 = arith.constant 0 : i32
    %c0_i32_0 = arith.constant 0 : i32
    %c0_i32_1 = arith.constant 0 : i32
    return %c0_i32, %c0_i32_0 : i32, i32
  }
}

</mosaic_0001>

<bundles_post_ra>
// kernel: multi_output_bert_forward.1
= control target key start
LH: loop header
LB: loop body
LE: loop exit
PB: predicated region body
PF: predicated region fallthrough
CT: control target
= control target key end

     0   :  { %11 = vsyncpa [#allocation3], 0  ;;  %s2855_s21 = smov [#allocation2]   ;;  %s3217_s0 = inlined_call_operand.vmem [shape: s32[16,1], index: 0, kind: input, shape index: {}]   ;;  %s3218_s1 = inlined_call_operand.vmem [shape: f32[1,16], index: 1, kind: input, shape index: {}]   ;;  %s3219_s2 = inlined_call_operand.vmem [shape: f32[128,32], index: 2, kind: input, shape index: {}]   ;;  %s3220_s3 = inlined_call_operand.vmem [shape: f32[16,32], index: 3, kind: input, shape index: {}]   ;;  %s3221_s4 = inlined_call_operand.hbm [shape: f32[384,128], index: 4, kind: input, shape index: {}]   ;;  %s3222_s5 = inlined_call_operand.vmem [shape: f32[24,128], index: 5, kind: input, shape index: {}]   ;;  %s3223_s6 = inlined_call_operand.vmem [shape: f32[2,128], index: 6, kind: output, shape index: {}]  }
   0x1   :  { %s25_s22 = sshll.u32 %s2855_s21, 4  ;;  %s2831_s25 = scalar_lea.hbm %s3221_s4, 6144  ;;  %s26_s22 = int_to_ptr.vmem [resolvable:$true] %s25_s22 }
   0x2   :  { %p2832_p0 = scmp.ne.s32.totalorder %s3221_s4, %s2831_s25  ;;  %p2835_p1 = scmp.lt.u32.totalorder %s2831_s25, %s3221_s4 }
   0x4   :  { %p2837_p2 = pnand %p2835_p1, %p2832_p0 }
   0x6   :  { %2840 = shalt.err (!%p2837_p2)
}
   0x7   :  { %s2841_s30 = scalar_lea.vmem %s26_s22, 6144  ;;  %p2846_p4 = scmp.lt.s32.totalorder %s26_s22, %s26_s22 }
   0x8   :  { %p2842_p3 = scmp.ne.s32.totalorder %s26_s22, %s2841_s30  ;;  %p2847_p5 = scmp.lt.s32.totalorder %s2841_s30, %s2841_s30 }
   0xa   :  { %p2848_p6 = por %p2847_p5, %p2846_p4 }
   0xc   :  { %p2849_p7 = pnand %p2848_p6, %p2842_p3 }
   0xe   :  { %2852 = shalt.err (!%p2849_p7)
}
   0xf   :  { %s2856_s7 = smov 128   ;;  %s2857_s8 = smov 8  }
  0x10   :  { %31 = dma.hbm_to_vmem [thread:$0]  %s3221_s4, 6144, %s26_s22, [#allocation3], %s2856_s7, %s2856_s7, %s2857_s8  }
  0x11   :  { %2853 = dma.done.wait [#allocation3], 6144  }
  0x12   :  { %2854 = vsyncadd [#allocation3], 4294961152  ;;  %v2858_v0 = vmov 0   ;;  %v37_v1 = vld [vmem:[%s3217_s0] sm:$0xff]  ;;  %v54_v3 = vld [vmem:[%s3219_s2 + $0x8] sm:$0xff]  ;;  %v39_v27 = vlaneseq  ;;  %v2859_v30 = vmov 1.0  }
  0x13   :  { %2728 = vset.pattern.permute.xlu0 %v2858_v0  ;;  %v53_v2 = vld [vmem:[%s3219_s2] sm:$0xff]  ;;  %v55_v4 = vld [vmem:[%s3219_s2 + $0x10] sm:$0xff]  ;;  %v56_v5 = vld [vmem:[%s3219_s2 + $0x18] sm:$0xff]  ;;  %vm146_vm2 = vcmask 261120   ;;  %vm319_vm3 = vcmask 130048   ;;  %s2863_s30 = smov 64  }
  0x14   :  { %42 = vperm.xlu0 %2728, %v37_v1   ;;  %v38_v6 = vld [vmem:[%s3217_s0 + $0x8] sm:$0xff]  ;;  %v2549_v7 = vpack.c.bf16 %v54_v3, %v53_v2  ;;  %v2553_v8 = vpack.c.bf16 %v56_v5, %v55_v4  ;;  %v57_v9 = vld [vmem:[%s3219_s2 + $0x20] sm:$0xff]  ;;  %v59_v12 = vld [vmem:[%s3219_s2 + $0x30] sm:$0xff]  ;;  %v2972_v28 = vand.u32 127, %v39_v27  ;;  %s2860_s0 = smov 96   ;;  %s2864_s7 = smov 112  }
  0x15   :  { %v58_v10 = vld [vmem:[%s3219_s2 + $0x28] sm:$0xff]  ;;  %v60_v13 = vld [vmem:[%s3219_s2 + $0x38] sm:$0xff]  ;;  %v61_v15 = vld [vmem:[%s3219_s2 + $0x40] sm:$0xff]  ;;  %s2865_s8 = smov 48   ;;  %s2866_s9 = smov 16   ;;  %vm967_vm7 = vcmask 523264  }
  0x16   :  { %2550 = vmatprep.subr.bf16.mxu0 %v2549_v7  ;;  %v2557_v11 = vpack.c.bf16 %v58_v10, %v57_v9  ;;  %v2561_v14 = vpack.c.bf16 %v60_v13, %v59_v12  ;;  %v62_v16 = vld [vmem:[%s3219_s2 + $0x48] sm:$0xff]  ;;  %v63_v18 = vld [vmem:[%s3219_s2 + $0x50] sm:$0xff]  ;;  %v64_v19 = vld [vmem:[%s3219_s2 + $0x58] sm:$0xff]  ;;  %vm2868_vm8 = vmmov 0   ;;  %vm1984_vm9 = vcmask 1040384  }
  0x17   :  { %2552 = vmatpush3.bf16.msra.mxu0 %v2549_v7  ;;  %v2565_v17 = vpack.c.bf16 %v62_v16, %v61_v15  ;;  %v2569_v20 = vpack.c.bf16 %v64_v19, %v63_v18  ;;  %v65_v21 = vld [vmem:[%s3219_s2 + $0x60] sm:$0xff]  ;;  %v66_v22 = vld [vmem:[%s3219_s2 + $0x68] sm:$0xff]  ;;  %v67_v24 = vld [vmem:[%s3219_s2 + $0x70] sm:$0xff]  ;;  %v189_v19 = vshrl.u32 %v39_v27, 7 }
  0x18   :  { %45 = vperm.xlu0 %2728, %v38_v6   ;;  %2554 = vmatprep.subr.bf16.mxu0 %v2553_v8  ;;  %v2573_v23 = vpack.c.bf16 %v66_v22, %v65_v21  ;;  %v68_v25 = vld [vmem:[%s3219_s2 + $0x78] sm:$0xff]  ;;  %v69_v32 = vld [vmem:[%s3220_s3] sm:$0xff]  ;;  %v70_v34 = vld [vmem:[%s3220_s3 + $0x8] sm:$0xff]  ;;  %v193_v22 = vshrl.u32 %v2972_v28, 3 }
  0x19   :  { %v2577_v26 = vpack.c.bf16 %v68_v25, %v67_v24  ;;  %v207_v50 = vld [vmem:[#allocation2] sm:$0xff]  ;;  %v208_v51 = vld [vmem:[#allocation2 + $0x8] sm:$0xff]  ;;  %v209_v52 = vld [vmem:[#allocation2 + $0x10] sm:$0xff]  ;;  %v2861_v24 = vmov -1e+09  }
  0x1a   :  { %v2581_v53 = vpack.c.bf16 %v208_v51, %v207_v50  ;;  %v210_v54 = vld [vmem:[#allocation2 + $0x18] sm:$0xff]  ;;  %v2153_v63 = vld [vmem:[%s3222_s5] ss:$0 sm:$0xff]  ;;  %v2154_v1 = vld [vmem:[%s3222_s5 + $0x1] ss:$0 sm:$0xff] }
  0x1b   :  { %2556 = vmatpush3.bf16.msra.mxu0 %v2553_v8  ;;  %v2585_v55 = vpack.c.bf16 %v210_v54, %v209_v52  ;;  %v2156_v8 = vld [vmem:[%s3222_s5 + $0x2] ss:$0 sm:$0xff]  ;;  %vm3017_vm4 = vmpackc.low %vm319_vm3, %vm319_vm3 }
  0x1c   :  { %2558 = vmatprep.subr.bf16.mxu0 %v2557_v11  ;;  %2582 = vmatprep.subr.bf16.mxu1 %v2581_v53 }
  0x1d   :  { %2584 = vmatpush3.bf16.msra.mxu1 %v2581_v53 }
  0x1e   :  { %2586 = vmatprep.subr.bf16.mxu1 %v2585_v55 }
  0x1f   :  { %2560 = vmatpush3.bf16.msra.mxu0 %v2557_v11 }
  0x20   :  { %2562 = vmatprep.subr.bf16.mxu0 %v2561_v14 }
  0x21   :  { %2588 = vmatpush3.bf16.msra.mxu1 %v2585_v55 }
  0x23   :  { %2564 = vmatpush3.bf16.msra.mxu0 %v2561_v14 }
  0x24   :  { %2566 = vmatprep.subr.bf16.mxu0 %v2565_v17 }
  0x27   :  { %2568 = vmatpush3.bf16.msra.mxu0 %v2565_v17 }
  0x28   :  { %2570 = vmatprep.subr.bf16.mxu0 %v2569_v20 }
  0x2b   :  { %2572 = vmatpush3.bf16.msra.mxu0 %v2569_v20  ;;  %v190_v20 = vadd.s32 8, %v189_v19 }
  0x2c   :  { %2574 = vmatprep.subr.bf16.mxu0 %v2573_v23 }
  0x2d   :  { %v192_v21 = vshrl.u32 %v190_v20, 3 }
  0x2f   :  { %2576 = vmatpush3.bf16.msra.mxu0 %v2573_v23  ;;  %v191_v23 = vshrl.u32 %v189_v19, 3  ;;  %vm195_vm5 = vcmp.eq.s32.totalorder %v192_v21, %v193_v22 }
  0x30   :  { %2578 = vmatprep.subr.bf16.mxu0 %v2577_v26  ;;  %v197_v25 = vsel %vm195_vm5, 0.0, %v2861_v24 }
  0x31   :  { %vm194_vm6 = vcmp.eq.s32.totalorder %v191_v23, %v193_v22 }
  0x33   :  { %2580 = vmatpush3.bf16.msra.mxu0 %v2577_v26  ;;  %v2155_v26 = vld [vmem:[%s3218_s1] ss:$0 sm:$0xff]  ;;  %s2862_s1 = smov 80  }
  0x93   :  { %v43_v29 = vpop.permute.xlu0 %42 }
  0x94   :  { %vm47_vm0 = vcmp.eq.s32.totalorder %v43_v29, %v2972_v28  ;;  %v196_v29 = vsel %vm194_vm6, 0.0, %v2861_v24 }
  0x95   :  { %2364 = vmatprep.mubr.msk.f32.mxu0 %vm47_vm0, %v2859_v30 }
  0x97   :  { %v46_v31 = vpop.permute.xlu0 %45 }
  0x98   :  { %vm48_vm1 = vcmp.eq.s32.totalorder %v46_v31, %v2972_v28 }
  0x99   :  { %2365 = vmatmul.mubr.msk.f32.vlgmr.msra.gmra.mrb[0].mxu0 %vm48_vm1, %v2859_v30  ;;  %v3032_v30 = vadd.f32 %v2155_v26, %v197_v25 }
 0x16c   :  { %v2366_v33 = vpop.f32.mrb[0].mxu0 }
 0x16d   :  { %v137_v35 = vpop.f32.mrb[1].mxu0  ;;  %v143_v37 = vadd.f32 %v2366_v33, %v70_v34 }
 0x16e   :  { %v138_v36 = vadd.f32 %v137_v35, %v69_v32  ;;  %v3034_v32 = vadd.f32 %v2155_v26, %v196_v29 }
 0x16f   :  { %v150_v39 = vsel %vm146_vm2, %v143_v37, 0.0 }
 0x170   :  { %v147_v38 = vsel %vm146_vm2, %v138_v36, 0.0 }
 0x171   :  { %148 = vadd.xlane.f32.xlu1 %v147_v38 }
 0x175   :  { %151 = vadd.xlane.f32.xlu1 %v150_v39 }
 0x1fe   :  { %v149_v40 = vpop.xlane.xlu1 %148 }
 0x1ff   :  { %v154_v41 = vmul.f32 0.03125, %v149_v40 }
 0x201   :  { %v156_v42 = vsub.f32 %v138_v36, %v154_v41 }
 0x202   :  { %v152_v43 = vpop.xlane.xlu1 %151 }
 0x203   :  { %v155_v44 = vmul.f32 0.03125, %v152_v43  ;;  %v158_v45 = vmul.f32 %v156_v42, %v156_v42 }
 0x205   :  { %v157_v46 = vsub.f32 %v143_v37, %v155_v44  ;;  %v160_v47 = vsel %vm146_vm2, %v158_v45, 0.0 }
 0x206   :  { %161 = vadd.xlane.f32.xlu0 %v160_v47 }
 0x207   :  { %v159_v48 = vmul.f32 %v157_v46, %v157_v46 }
 0x209   :  { %v163_v49 = vsel %vm146_vm2, %v159_v48, 0.0 }
 0x20a   :  { %164 = vadd.xlane.f32.xlu1 %v163_v49 }
 0x293   :  { %v162_v56 = vpop.xlane.xlu0 %161 }
 0x294   :  { %v166_v57 = vmul.f32 0.03125, %v162_v56 }
 0x296   :  { %v168_v58 = vadd.f32 1e-12, %v166_v57 }
 0x297   :  { %v165_v59 = vpop.xlane.xlu1 %164 }
 0x298   :  { %2769 = vrsqrt.f32 %v168_v58  ;;  %v167_v60 = vmul.f32 0.03125, %v165_v59 }
 0x29a   :  { %v169_v61 = vadd.f32 1e-12, %v167_v60 }
 0x29c   :  { %2771 = vrsqrt.f32 %v169_v61 }
 0x2a2   :  { %v2770_v62 = vpop.eup %2769 }
 0x2a3   :  { %v172_v0 = vmul.f32 %v2770_v62, %v156_v42 }
 0x2a5   :  { %v179_v2 = vmul.f32 %v2153_v63, %v172_v0 }
 0x2a6   :  { %v2772_v3 = vpop.eup %2771 }
 0x2a7   :  { %v173_v4 = vmul.f32 %v2772_v3, %v157_v46  ;;  %v2992_v5 = vadd.f32 %v2154_v1, %v179_v2 }
 0x2a9   :  { %v180_v6 = vmul.f32 %v2153_v63, %v173_v4  ;;  %2375 = vmatprep.mubr.msk.f32.mxu1 %vm146_vm2, %v2992_v5 }
 0x2ab   :  { %v2996_v7 = vadd.f32 %v2154_v1, %v180_v6 }
 0x2ad   :  { %2376 = vmatmul.mubr.msk.f32.vlgmr.msra.gmra.mrb[0].mxu1 %vm146_vm2, %v2996_v7 }
 0x380   :  { %v2377_v9 = vpop.f32.mrb[0].mxu1 }
 0x381   :  { %v3003_v10 = vadd.f32 %v2377_v9, %v2156_v8  ;;  %v304_v11 = vpop.f32.mrb[1].mxu1 }
 0x382   :  { %v3005_v12 = vadd.f32 %v2156_v8, %v304_v11 }
 0x384   :  { %2382 = vmatprep.mubr.msk.f32.mxu1 %vm319_vm3, %v3005_v12  ;;  %v3011_v13 = vpack.i.bf16 %v3003_v10, %v3005_v12 }
 0x386   :  { %2730 = vrot.lane.b32.xlu1 %v3011_v13, %s2860_s0 }
 0x3f8   :  { %v2731_v14 = vpop.permute.xlu1 %2730 }
 0x3f9   :  { %v2733_v15 = vunpack.i.h.bf16 %v2731_v14  ;;  %v2732_v16 = vunpack.i.l.bf16 %v2731_v14 }
 0x3fb   :  { %v2589_v18 = vpack.c.bf16 %v2733_v15, %v2732_v16 }
 0x3fd   :  { %2591 = vmatprep.subr.msk.bf16.mxu1 %vm3017_vm4, %v2589_v18 }
 0x3fe   :  { %2594 = vmatpush3.bf16.xpose.msk.msra.mxu1 %vm3017_vm4, %v2589_v18 }
 0x405   :  { %2383 = vmatmul.mubr.msk.f32.vlgmr.msra.gmra.mrb[2].mxu1 %vm319_vm3, %v3003_v10 }
 0x4d8   :  { %v2384_v31 = vpop.f32.mrb[2].mxu1 }
 0x4d9   :  { %v404_v27 = vmul.f32 0.25, %v2384_v31  ;;  %v394_v33 = vpop.f32.mrb[3].mxu1 }
 0x4da   :  { %v403_v34 = vmul.f32 0.25, %v394_v33 }
 0x4db   :  { %v406_v28 = vadd.f32 %v404_v27, %v3032_v30 }
 0x4dc   :  { %v405_v35 = vadd.f32 %v403_v34, %v3034_v32 }
 0x4dd   :  { %v410_v36 = vsel %vm319_vm3, %v406_v28, -inf }
 0x4de   :  { %411 = vmax.xlane.f32.xlu0 %v410_v36  ;;  %v407_v37 = vsel %vm319_vm3, %v405_v35, -inf  ;;  %v212_v36 = vld [vmem:[#allocation2 + $0x28] sm:$0xff] }
 0x4df   :  { %408 = vmax.xlane.f32.xlu1 %v407_v37  ;;  %v213_v37 = vld [vmem:[#allocation2 + $0x30] sm:$0xff] }
 0x4f0   :  { %2740 = vrot.lane.b32.xlu1 %v3011_v13, %s2862_s1 }
 0x4f4   :  { %2735 = vrot.lane.b32.xlu0 %v3011_v13, %s2863_s30 }
 0x56b   :  { %v412_v38 = vpop.xlane.xlu0 %411 }
 0x56c   :  { %v414_v39 = vsub.f32 %v406_v28, %v412_v38  ;;  %v409_v40 = vpop.xlane.xlu1 %408 }
 0x56d   :  { %v413_v41 = vsub.f32 %v405_v35, %v409_v40  ;;  %v211_v35 = vld [vmem:[#allocation2 + $0x20] sm:$0xff] }
 0x56e   :  { %v417_v42 = vmul.f32 1.442695, %v414_v39  ;;  %v2609_v38 = vpack.c.bf16 %v212_v36, %v211_v35  ;;  %v214_v39 = vld [vmem:[#allocation2 + $0x38] sm:$0xff]  ;;  %v225_v36 = vld [vmem:[#allocation2 + $0x90] sm:$0xff] }
 0x56f   :  { %v415_v43 = vmul.f32 1.442695, %v413_v41  ;;  %v2736_v44 = vpop.permute.xlu0 %2735  ;;  %v2613_v40 = vpack.c.bf16 %v214_v39, %v213_v37  ;;  %v226_v37 = vld [vmem:[#allocation2 + $0x98] sm:$0xff]  ;;  %v2176_v39 = vld [vmem:[%s3222_s5 + $0x6] ss:$0 sm:$0xff] }
 0x570   :  { %2773 = vpow2.f32 %v417_v42  ;;  %v2738_v45 = vunpack.i.h.bf16 %v2736_v44  ;;  %v2737_v46 = vunpack.i.l.bf16 %v2736_v44  ;;  %v2741_v47 = vpop.permute.xlu1 %2740  ;;  %2610 = vmatprep.subr.bf16.mxu0 %v2609_v38 }
 0x571   :  { %v2743_v48 = vunpack.i.h.bf16 %v2741_v47  ;;  %v2742_v49 = vunpack.i.l.bf16 %v2741_v47  ;;  %2775 = vpow2.f32 %v415_v43  ;;  %2612 = vmatpush3.bf16.msra.mxu0 %v2609_v38  ;;  %v2171_v47 = vld [vmem:[%s3222_s5 + $0x3] ss:$0 sm:$0xff]  ;;  %v2637_v38 = vpack.c.bf16 %v226_v37, %v225_v36 }
 0x572   :  { %v2595_v50 = vpack.c.bf16 %v2738_v45, %v2737_v46  ;;  %2614 = vmatprep.subr.bf16.mxu0 %v2613_v40 }
 0x573   :  { %v2599_v51 = vpack.c.bf16 %v2743_v48, %v2742_v49 }
 0x574   :  { %2596 = vmatprep.subr.bf16.mxu1 %v2595_v50 }
 0x575   :  { %2598 = vmatpush3.bf16.msra.mxu1 %v2595_v50  ;;  %2616 = vmatpush3.bf16.msra.mxu0 %v2613_v40 }
 0x576   :  { %2601 = vmatprep.subr.msk.bf16.mxu1 %vm3017_vm4, %v2599_v51 }
 0x57a   :  { %v2774_v52 = vpop.eup %2773 }
 0x57b   :  { %v422_v53 = vsel %vm319_vm3, %v2774_v52, 0.0  ;;  %v2776_v54 = vpop.eup %2775 }
 0x57c   :  { %423 = vadd.xlane.f32.xlu0 %v422_v53  ;;  %v419_v55 = vsel %vm319_vm3, %v2776_v54, 0.0 }
 0x580   :  { %420 = vadd.xlane.f32.xlu0 %v419_v55 }
 0x596   :  { %516 = vrot.lane.b32.xlu0 %v3005_v12, %s2864_s7 }
 0x59a   :  { %518 = vrot.lane.b32.xlu0 %v3003_v10, %s2864_s7 }
 0x609   :  { %v424_v56 = vpop.xlane.xlu0 %423 }
 0x60a   :  { %2777 = vrcp.f32 %v424_v56 }
 0x60d   :  { %v421_v57 = vpop.xlane.xlu0 %420 }
 0x60e   :  { %2779 = vrcp.f32 %v421_v57 }
 0x611   :  { %v517_v62 = vpop.permute.xlu0 %516 }
 0x614   :  { %v2778_v58 = vpop.eup %2777 }
 0x615   :  { %v428_v61 = vmul.f32 %v2778_v58, %v2774_v52  ;;  %v519_v63 = vpop.permute.xlu0 %518 }
 0x618   :  { %v2780_v59 = vpop.eup %2779 }
 0x619   :  { %v426_v60 = vmul.f32 %v2780_v59, %v2776_v54 }
 0x61b   :  { %2389 = vmatprep.mubr.msk.f32.mxu1 %vm319_vm3, %v426_v60 }
 0x61c   :  { %2390 = vmatmul.mubr.msk.f32.vlgmr.msra.gmra.mrb[4].mxu1 %vm319_vm3, %v428_v61 }
 0x61d   :  { %2604 = vmatpush3.bf16.xpose.msk.msra.mxu1 %vm3017_vm4, %v2599_v51  ;;  %2396 = vmatprep.mubr.msk.f32.mxu1 %vm319_vm3, %v517_v62 }
 0x624   :  { %2397 = vmatmul.mubr.msk.f32.vlgmr.msra.gmra.mrb[6].mxu1 %vm319_vm3, %v519_v63 }
 0x6ef   :  { %v3058_v0 = vpop.f32.mrb[4].mxu1 }
 0x6f0   :  { %v507_v1 = vpop.f32.mrb[5].mxu1 }
 0x6f7   :  { %v2398_v2 = vpop.f32.mrb[6].mxu1 }
 0x6f8   :  { %v608_v3 = vmul.f32 0.25, %v2398_v2  ;;  %v598_v4 = vpop.f32.mrb[7].mxu1 }
 0x6f9   :  { %v607_v6 = vmul.f32 0.25, %v598_v4  ;;  %v218_v4 = vld [vmem:[#allocation2 + $0x58] sm:$0xff] }
 0x6fa   :  { %v610_v8 = vadd.f32 %v608_v3, %v3032_v30  ;;  %v217_v3 = vld [vmem:[#allocation2 + $0x50] sm:$0xff] }
 0x6fb   :  { %v609_v9 = vadd.f32 %v607_v6, %v3034_v32  ;;  %v2621_v6 = vpack.c.bf16 %v218_v4, %v217_v3 }
 0x6fc   :  { %v614_v10 = vsel %vm319_vm3, %v610_v8, -inf }
 0x6fd   :  { %615 = vmax.xlane.f32.xlu1 %v614_v10  ;;  %v611_v11 = vsel %vm319_vm3, %v609_v9, -inf }
 0x6fe   :  { %612 = vmax.xlane.f32.xlu0 %v611_v11 }
 0x70e   :  { %2745 = vrot.lane.b32.xlu1 %v3011_v13, %s2865_s8 }
 0x78a   :  { %v616_v12 = vpop.xlane.xlu1 %615 }
 0x78b   :  { %v618_v14 = vsub.f32 %v610_v8, %v616_v12  ;;  %v613_v15 = vpop.xlane.xlu0 %612 }
 0x78c   :  { %v617_v16 = vsub.f32 %v609_v9, %v613_v15 }
 0x78d   :  { %v621_v18 = vmul.f32 1.442695, %v618_v14 }
 0x78e   :  { %v619_v19 = vmul.f32 1.442695, %v617_v16  ;;  %v2746_v20 = vpop.permute.xlu1 %2745  ;;  %v2174_v16 = vld [vmem:[%s3222_s5 + $0x4] ss:$0 sm:$0xff] }
 0x78f   :  { %v2748_v21 = vunpack.i.h.bf16 %v2746_v20  ;;  %v2747_v22 = vunpack.i.l.bf16 %v2746_v20 }
 0x790   :  { %2781 = vpow2.f32 %v619_v19 }
 0x791   :  { %v2605_v23 = vpack.c.bf16 %v2748_v21, %v2747_v22  ;;  %2783 = vpow2.f32 %v621_v18  ;;  %v2175_v22 = vld [vmem:[%s3222_s5 + $0x5] ss:$0 sm:$0xff] }
 0x793   :  { %2606 = vmatprep.subr.bf16.mxu1 %v2605_v23 }
 0x794   :  { %2608 = vmatpush3.bf16.msra.mxu1 %v2605_v23 }
 0x79a   :  { %v2782_v24 = vpop.eup %2781 }
 0x79b   :  { %v623_v25 = vsel %vm319_vm3, %v2782_v24, 0.0  ;;  %v2784_v26 = vpop.eup %2783 }
 0x79c   :  { %624 = vadd.xlane.f32.xlu0 %v623_v25  ;;  %v626_v13 = vsel %vm319_vm3, %v2784_v26, 0.0 }
 0x7a0   :  { %627 = vadd.xlane.f32.xlu0 %v626_v13  ;;  %v220_v13 = vld [vmem:[#allocation2 + $0x68] sm:$0xff] }
 0x829   :  { %v625_v29 = vpop.xlane.xlu0 %624 }
 0x82a   :  { %2785 = vrcp.f32 %v625_v29 }
 0x82d   :  { %v628_v31 = vpop.xlane.xlu0 %627 }
 0x82e   :  { %2787 = vrcp.f32 %v628_v31  ;;  %v221_v31 = vld [vmem:[#allocation2 + $0x70] sm:$0xff] }
 0x834   :  { %v2786_v27 = vpop.eup %2785 }
 0x835   :  { %v630_v33 = vmul.f32 %v2786_v27, %v2782_v24  ;;  %v222_v27 = vld [vmem:[#allocation2 + $0x78] sm:$0xff] }
 0x837   :  { %2403 = vmatprep.mubr.msk.f32.mxu1 %vm319_vm3, %v630_v33  ;;  %v223_v33 = vld [vmem:[#allocation2 + $0x80] sm:$0xff] }
 0x838   :  { %v2788_v34 = vpop.eup %2787 }
 0x839   :  { %v632_v28 = vmul.f32 %v2788_v34, %v2784_v26  ;;  %v219_v26 = vld [vmem:[#allocation2 + $0x60] sm:$0xff]  ;;  %v2629_v34 = vpack.c.bf16 %v222_v27, %v221_v31 }
 0x83a   :  { %v2625_v29 = vpack.c.bf16 %v220_v13, %v219_v26 }
 0x83b   :  { %2404 = vmatmul.mubr.msk.f32.vlgmr.msra.gmra.mrb[8].mxu1 %vm319_vm3, %v632_v28  ;;  %v224_v28 = vld [vmem:[#allocation2 + $0x88] sm:$0xff] }
 0x83c   :  { %2626 = vmatprep.subr.bf16.mxu0 %v2625_v29  ;;  %v2633_v35 = vpack.c.bf16 %v224_v28, %v223_v33 }
 0x90e   :  { %v2405_v41 = vpop.f32.mrb[8].mxu1 }
 0x90f   :  { %724 = vrot.lane.b32.xlu1 %v2405_v41, %s2866_s9  ;;  %v711_v42 = vpop.f32.mrb[9].mxu1 }
 0x910   :  { %722 = vrot.lane.b32.xlu0 %v711_v42, %s2866_s9 }
 0x981   :  { %v725_v43 = vpop.permute.xlu1 %724 }
 0x982   :  { %v723_v44 = vpop.permute.xlu0 %722  ;;  %v729_v46 = vsel %vm319_vm3, %v3058_v0, %v725_v43 }
 0x983   :  { %v728_v45 = vsel %vm319_vm3, %v507_v1, %v723_v44  ;;  %v216_v1 = vld [vmem:[#allocation2 + $0x48] sm:$0xff] }
 0x984   :  { %2414 = vmatprep.mubr.msk.f32.mxu0 %vm146_vm2, %v728_v45 }
 0x985   :  { %2415 = vmatmul.mubr.msk.f32.vlgmr.msra.gmra.mrb[2].mxu0 %vm146_vm2, %v729_v46 }
 0x986   :  { %2628 = vmatpush3.bf16.msra.mxu0 %v2625_v29 }
 0x987   :  { %2630 = vmatprep.subr.bf16.mxu0 %v2629_v34 }
 0x98a   :  { %2632 = vmatpush3.bf16.msra.mxu0 %v2629_v34  ;;  %v2182_v34 = vld [vmem:[%s3222_s5 + $0x8] ss:$0 sm:$0xff] }
 0x98b   :  { %2634 = vmatprep.subr.bf16.mxu0 %v2633_v35 }
 0x98e   :  { %2636 = vmatpush3.bf16.msra.mxu0 %v2633_v35 }
 0x98f   :  { %2638 = vmatprep.subr.bf16.mxu0 %v2637_v38 }
 0x992   :  { %2640 = vmatpush3.bf16.msra.mxu0 %v2637_v38  ;;  %v2183_v38 = vld [vmem:[%s3222_s5 + $0x9] ss:$0 sm:$0xff] }
 0xa58   :  { %v2416_v48 = vpop.f32.mrb[2].mxu0 }
 0xa59   :  { %v813_v49 = vadd.f32 %v2416_v48, %v2171_v47  ;;  %v807_v50 = vpop.f32.mrb[3].mxu0 }
 0xa5a   :  { %v808_v51 = vadd.f32 %v2171_v47, %v807_v50 }
 0xa5b   :  { %v817_v52 = vadd.f32 %v813_v49, %v2996_v7 }
 0xa5c   :  { %v816_v53 = vadd.f32 %v808_v51, %v2992_v5  ;;  %v215_v5 = vld [vmem:[#allocation2 + $0x40] sm:$0xff] }
 0xa5d   :  { %v821_v54 = vsel %vm146_vm2, %v817_v52, 0.0  ;;  %v2617_v2 = vpack.c.bf16 %v216_v1, %v215_v5 }
 0xa5e   :  { %822 = vadd.xlane.f32.xlu0 %v821_v54  ;;  %v818_v55 = vsel %vm146_vm2, %v816_v53, 0.0 }
 0xa5f   :  { %819 = vadd.xlane.f32.xlu1 %v818_v55  ;;  %2618 = vmatprep.subr.bf16.mxu1 %v2617_v2 }
 0xa60   :  { %2620 = vmatpush3.bf16.msra.mxu1 %v2617_v2 }
 0xa61   :  { %2622 = vmatprep.subr.bf16.mxu1 %v2621_v6 }
 0xa64   :  { %2624 = vmatpush3.bf16.msra.mxu1 %v2621_v6 }
 0xaeb   :  { %v823_v56 = vpop.xlane.xlu0 %822 }
 0xaec   :  { %v825_v57 = vmul.f32 0.03125, %v823_v56  ;;  %v820_v58 = vpop.xlane.xlu1 %819 }
 0xaed   :  { %v824_v59 = vmul.f32 0.03125, %v820_v58 }
 0xaee   :  { %v827_v60 = vsub.f32 %v817_v52, %v825_v57 }
 0xaef   :  { %v826_v61 = vsub.f32 %v816_v53, %v824_v59 }
 0xaf0   :  { %v829_v62 = vmul.f32 %v827_v60, %v827_v60 }
 0xaf1   :  { %v828_v63 = vmul.f32 %v826_v61, %v826_v61 }
 0xaf2   :  { %v833_v0 = vsel %vm146_vm2, %v829_v62, 0.0  ;;  %v2179_v62 = vld [vmem:[%s3222_s5 + $0x7] ss:$0 sm:$0xff] }
 0xaf3   :  { %834 = vadd.xlane.f32.xlu1 %v833_v0  ;;  %v830_v7 = vsel %vm146_vm2, %v828_v63, 0.0 }
 0xaf4   :  { %831 = vadd.xlane.f32.xlu0 %v830_v7 }
 0xb80   :  { %v835_v8 = vpop.xlane.xlu1 %834 }
 0xb81   :  { %v837_v9 = vmul.f32 0.03125, %v835_v8  ;;  %v832_v10 = vpop.xlane.xlu0 %831 }
 0xb82   :  { %v836_v11 = vmul.f32 0.03125, %v832_v10 }
 0xb83   :  { %v839_v12 = vadd.f32 1e-12, %v837_v9 }
 0xb84   :  { %v838_v14 = vadd.f32 1e-12, %v836_v11 }
 0xb85   :  { %2789 = vrsqrt.f32 %v839_v12 }
 0xb86   :  { %2791 = vrsqrt.f32 %v838_v14 }
 0xb8f   :  { %v2790_v15 = vpop.eup %2789 }
 0xb90   :  { %v2792_v18 = vpop.eup %2791  ;;  %v843_v19 = vmul.f32 %v2790_v15, %v827_v60 }
 0xb91   :  { %v842_v20 = vmul.f32 %v2792_v18, %v826_v61 }
 0xb92   :  { %v850_v21 = vmul.f32 %v2174_v16, %v843_v19  ;;  %v1091_v19 = vld [vmem:[#allocation2 + $0xa0] sm:$0xff] }
 0xb93   :  { %v849_v23 = vmul.f32 %v2174_v16, %v842_v20  ;;  %v1092_v20 = vld [vmem:[#allocation2 + $0xa8] sm:$0xff] }
 0xb94   :  { %v857_v25 = vadd.f32 %v2175_v22, %v850_v21  ;;  %v2641_v21 = vpack.c.bf16 %v1092_v20, %v1091_v19 }
 0xb95   :  { %v856_v24 = vadd.f32 %v2175_v22, %v849_v23  ;;  %v1093_v22 = vld [vmem:[#allocation2 + $0xb0] sm:$0xff]  ;;  %v1094_v23 = vld [vmem:[#allocation2 + $0xb8] sm:$0xff] }
 0xb96   :  { %2642 = vmatprep.subr.bf16.mxu1 %v2641_v21 }
 0xb97   :  { %2425 = vmatprep.mubr.msk.f32.mxu1 %vm146_vm2, %v856_v24 }
 0xb98   :  { %2426 = vmatmul.mubr.msk.f32.vlgmr.msra.gmra.mrb[10].mxu1 %vm146_vm2, %v857_v25 }
 0xb99   :  { %2644 = vmatpush3.bf16.msra.mxu1 %v2641_v21 }
 0xc6b   :  { %v2427_v40 = vpop.f32.mrb[10].mxu1 }
 0xc6c   :  { %v941_v41 = vadd.f32 %v2427_v40, %v2176_v39  ;;  %v935_v42 = vpop.f32.mrb[11].mxu1 }
 0xc6d   :  { %v936_v43 = vadd.f32 %v2176_v39, %v935_v42  ;;  %v2184_v42 = vld [vmem:[%s3222_s5 + $0xa] ss:$0 sm:$0xff] }
 0xc6e   :  { %v947_v44 = vmul.f32 0.044715, %v941_v41  ;;  %v945_v59 = vmul.f32 0.5, %v941_v41 }
 0xc6f   :  { %v946_v45 = vmul.f32 0.044715, %v936_v43  ;;  %v944_v57 = vmul.f32 0.5, %v936_v43 }
 0xc70   :  { %v949_v46 = vmul.f32 %v947_v44, %v941_v41 }
 0xc71   :  { %v948_v47 = vmul.f32 %v946_v45, %v936_v43 }
 0xc72   :  { %v951_v48 = vmul.f32 %v949_v46, %v941_v41 }
 0xc73   :  { %v950_v49 = vmul.f32 %v948_v47, %v936_v43 }
 0xc74   :  { %v953_v50 = vadd.f32 %v951_v48, %v941_v41 }
 0xc75   :  { %v952_v51 = vadd.f32 %v950_v49, %v936_v43 }
 0xc76   :  { %v955_v52 = vmul.f32 0.7978846, %v953_v50 }
 0xc77   :  { %v954_v53 = vmul.f32 0.7978846, %v952_v51 }
 0xc78   :  { %2793 = vtanh.f32 %v955_v52 }
 0xc79   :  { %2795 = vtanh.f32 %v954_v53 }
 0xc82   :  { %v2794_v54 = vpop.eup %2793 }
 0xc83   :  { %v2796_v55 = vpop.eup %2795  ;;  %v959_v56 = vadd.f32 1.0, %v2794_v54 }
 0xc84   :  { %v958_v58 = vadd.f32 1.0, %v2796_v55 }
 0xc85   :  { %v961_v61 = vmul.f32 %v959_v56, %v945_v59 }
 0xc86   :  { %v960_v60 = vmul.f32 %v958_v58, %v944_v57 }
 0xc88   :  { %2444 = vmatprep.mubr.msk.f32.mxu0 %vm967_vm7, %v960_v60 }
 0xc89   :  { %2445 = vmatmul.mubr.msk.f32.vlgmr.msra.gmra.mrb[4].mxu0 %vm967_vm7, %v961_v61 }
 0xd5c   :  { %v2446_v63 = vpop.f32.mrb[4].mxu0 }
 0xd5d   :  { %v1046_v0 = vadd.f32 %v2446_v63, %v2179_v62  ;;  %v1040_v7 = vpop.f32.mrb[5].mxu0 }
 0xd5e   :  { %v1041_v5 = vadd.f32 %v2179_v62, %v1040_v7 }
 0xd5f   :  { %v1050_v1 = vadd.f32 %v1046_v0, %v857_v25 }
 0xd60   :  { %v1049_v2 = vadd.f32 %v1041_v5, %v856_v24  ;;  %v2645_v24 = vpack.c.bf16 %v1094_v23, %v1093_v22 }
 0xd61   :  { %v1054_v3 = vsel %vm146_vm2, %v1050_v1, 0.0 }
 0xd62   :  { %1055 = vadd.xlane.f32.xlu1 %v1054_v3  ;;  %v1051_v4 = vsel %vm146_vm2, %v1049_v2, 0.0  ;;  %2646 = vmatprep.subr.bf16.mxu1 %v2645_v24 }
 0xd63   :  { %1052 = vadd.xlane.f32.xlu0 %v1051_v4  ;;  %2648 = vmatpush3.bf16.msra.mxu1 %v2645_v24 }
 0xdef   :  { %v1056_v6 = vpop.xlane.xlu1 %1055 }
 0xdf0   :  { %v1058_v8 = vmul.f32 0.03125, %v1056_v6  ;;  %v1053_v9 = vpop.xlane.xlu0 %1052 }
 0xdf1   :  { %v1057_v10 = vmul.f32 0.03125, %v1053_v9 }
 0xdf2   :  { %v1060_v11 = vsub.f32 %v1050_v1, %v1058_v8 }
 0xdf3   :  { %v1059_v12 = vsub.f32 %v1049_v2, %v1057_v10 }
 0xdf4   :  { %v1062_v14 = vmul.f32 %v1060_v11, %v1060_v11 }
 0xdf5   :  { %v1061_v15 = vmul.f32 %v1059_v12, %v1059_v12 }
 0xdf6   :  { %v1066_v16 = vsel %vm146_vm2, %v1062_v14, 0.0 }
 0xdf7   :  { %1067 = vadd.xlane.f32.xlu1 %v1066_v16  ;;  %v1063_v18 = vsel %vm146_vm2, %v1061_v15, 0.0 }
 0xdf8   :  { %1064 = vadd.xlane.f32.xlu0 %v1063_v18 }
 0xe84   :  { %v1068_v25 = vpop.xlane.xlu1 %1067 }
 0xe85   :  { %v1070_v26 = vmul.f32 0.03125, %v1068_v25  ;;  %v1065_v13 = vpop.xlane.xlu0 %1064 }
 0xe86   :  { %v1069_v29 = vmul.f32 0.03125, %v1065_v13 }
 0xe87   :  { %v1072_v31 = vadd.f32 1e-12, %v1070_v26 }
 0xe88   :  { %v1071_v27 = vadd.f32 1e-12, %v1069_v29 }
 0xe89   :  { %2797 = vrsqrt.f32 %v1072_v31 }
 0xe8a   :  { %2799 = vrsqrt.f32 %v1071_v27 }
 0xe93   :  { %v2798_v33 = vpop.eup %2797 }
 0xe94   :  { %v2800_v28 = vpop.eup %2799  ;;  %v1076_v35 = vmul.f32 %v2798_v33, %v1060_v11 }
 0xe95   :  { %v1075_v36 = vmul.f32 %v2800_v28, %v1059_v12 }
 0xe96   :  { %v1083_v37 = vmul.f32 %v2182_v34, %v1076_v35 }
 0xe97   :  { %v1082_v39 = vmul.f32 %v2182_v34, %v1075_v36 }
 0xe98   :  { %v3114_v41 = vadd.f32 %v2183_v38, %v1083_v37 }
 0xe99   :  { %v3112_v40 = vadd.f32 %v2183_v38, %v1082_v39 }
 0xe9b   :  { %2455 = vmatprep.mubr.msk.f32.mxu1 %vm146_vm2, %v3112_v40 }
 0xe9c   :  { %2456 = vmatmul.mubr.msk.f32.vlgmr.msra.gmra.mrb[12].mxu1 %vm146_vm2, %v3114_v41 }
 0xf6f   :  { %v2457_v43 = vpop.f32.mrb[12].mxu1 }
 0xf70   :  { %v1194_v44 = vadd.f32 %v2457_v43, %v2184_v42  ;;  %v1188_v45 = vpop.f32.mrb[13].mxu1 }
 0xf71   :  { %v1189_v46 = vadd.f32 %v2184_v42, %v1188_v45 }
 0xf73   :  { %2462 = vmatprep.mubr.msk.f32.mxu1 %vm319_vm3, %v1189_v46  ;;  %v3124_v47 = vpack.i.bf16 %v1194_v44, %v1189_v46 }
 0xf75   :  { %2755 = vrot.lane.b32.xlu1 %v3124_v47, %s2862_s1  ;;  %2750 = vrot.lane.b32.xlu0 %v3124_v47, %s2860_s0 }
 0xf79   :  { %1399 = vrot.lane.b32.xlu1 %v1189_v46, %s2864_s7  ;;  %1401 = vrot.lane.b32.xlu0 %v1194_v44, %s2864_s7 }
 0xfe7   :  { %v2756_v48 = vpop.permute.xlu1 %2755  ;;  %v2751_v49 = vpop.permute.xlu0 %2750 }
 0xfe8   :  { %v2758_v50 = vunpack.i.h.bf16 %v2756_v48  ;;  %v2757_v51 = vunpack.i.l.bf16 %v2756_v48  ;;  %v2753_v52 = vunpack.i.h.bf16 %v2751_v49  ;;  %v2752_v53 = vunpack.i.l.bf16 %v2751_v49 }
 0xfea   :  { %v2649_v54 = vpack.c.bf16 %v2753_v52, %v2752_v53  ;;  %v2659_v55 = vpack.c.bf16 %v2758_v50, %v2757_v51  ;;  %v1095_v52 = vld [vmem:[#allocation2 + $0xc0] sm:$0xff]  ;;  %v1096_v53 = vld [vmem:[#allocation2 + $0xc8] sm:$0xff] }
 0xfeb   :  { %v1400_v56 = vpop.permute.xlu1 %1399  ;;  %v1402_v57 = vpop.permute.xlu0 %1401 }
 0xfec   :  { %2651 = vmatprep.subr.msk.bf16.mxu1 %vm3017_vm4, %v2649_v54 }
 0xfed   :  { %2654 = vmatpush3.bf16.xpose.msk.msra.mxu1 %vm3017_vm4, %v2649_v54  ;;  %v1097_v54 = vld [vmem:[#allocation2 + $0xd0] sm:$0xff] }
 0xfee   :  { %2661 = vmatprep.subr.msk.bf16.mxu1 %vm3017_vm4, %v2659_v55 }
 0xff4   :  { %2463 = vmatmul.mubr.msk.f32.vlgmr.msra.gmra.mrb[14].mxu1 %vm319_vm3, %v1194_v44 }
 0xff5   :  { %2664 = vmatpush3.bf16.xpose.msk.msra.mxu1 %vm3017_vm4, %v2659_v55  ;;  %2476 = vmatprep.mubr.msk.f32.mxu1 %vm319_vm3, %v1400_v56  ;;  %v2669_v55 = vpack.c.bf16 %v1096_v53, %v1095_v52  ;;  %v1098_v56 = vld [vmem:[#allocation2 + $0xd8] sm:$0xff]  ;;  %v1109_v52 = vld [vmem:[#allocation2 + $0x130] sm:$0xff] }
 0xff6   :  { %v1110_v53 = vld [vmem:[#allocation2 + $0x138] sm:$0xff] }
 0xffc   :  { %2477 = vmatmul.mubr.msk.f32.vlgmr.msra.gmra.mrb[16].mxu1 %vm319_vm3, %v1402_v57  ;;  %v2673_v57 = vpack.c.bf16 %v1098_v56, %v1097_v54  ;;  %v2697_v54 = vpack.c.bf16 %v1110_v53, %v1109_v52  ;;  %v2211_v52 = vld [vmem:[%s3222_s5 + $0x11] ss:$0 sm:$0xff] }
0x10c7   :  { %v2464_v58 = vpop.f32.mrb[14].mxu1 }
0x10c8   :  { %v1287_v59 = vmul.f32 0.25, %v2464_v58  ;;  %v1277_v60 = vpop.f32.mrb[15].mxu1 }
0x10c9   :  { %v1286_v61 = vmul.f32 0.25, %v1277_v60 }
0x10ca   :  { %v1289_v62 = vadd.f32 %v1287_v59, %v3032_v30 }
0x10cb   :  { %v1288_v63 = vadd.f32 %v1286_v61, %v3034_v32 }
0x10cc   :  { %v1293_v0 = vsel %vm319_vm3, %v1289_v62, -inf }
0x10cd   :  { %1294 = vmax.xlane.f32.xlu0 %v1293_v0  ;;  %v1290_v7 = vsel %vm319_vm3, %v1288_v63, -inf }
0x10ce   :  { %1291 = vmax.xlane.f32.xlu1 %v1290_v7 }
0x10cf   :  { %v2478_v17 = vpop.f32.mrb[16].mxu1 }
0x10d0   :  { %v1491_v5 = vmul.f32 0.25, %v2478_v17  ;;  %v1481_v1 = vpop.f32.mrb[17].mxu1  ;;  %v2199_v17 = vld [vmem:[%s3222_s5 + $0xb] ss:$0 sm:$0xff] }
0x10d1   :  { %v1490_v2 = vmul.f32 0.25, %v1481_v1 }
0x10d2   :  { %v1493_v3 = vadd.f32 %v1491_v5, %v3032_v30 }
0x10d3   :  { %v1492_v4 = vadd.f32 %v1490_v2, %v3034_v32 }
0x10d4   :  { %v1497_v6 = vsel %vm319_vm3, %v1493_v3, -inf }
0x10d5   :  { %1498 = vmax.xlane.f32.xlu1 %v1497_v6  ;;  %v1494_v8 = vsel %vm319_vm3, %v1492_v4, -inf }
0x10d6   :  { %1495 = vmax.xlane.f32.xlu0 %v1494_v8 }
0x115a   :  { %v1295_v9 = vpop.xlane.xlu0 %1294 }
0x115b   :  { %v1297_v10 = vsub.f32 %v1289_v62, %v1295_v9  ;;  %v1292_v11 = vpop.xlane.xlu1 %1291 }
0x115c   :  { %v1296_v12 = vsub.f32 %v1288_v63, %v1292_v11 }
0x115d   :  { %v1300_v14 = vmul.f32 1.442695, %v1297_v10 }
0x115e   :  { %v1298_v15 = vmul.f32 1.442695, %v1296_v12 }
0x115f   :  { %2801 = vpow2.f32 %v1300_v14 }
0x1160   :  { %2803 = vpow2.f32 %v1298_v15 }
0x1162   :  { %v1499_v16 = vpop.xlane.xlu1 %1498 }
0x1163   :  { %v1501_v18 = vsub.f32 %v1493_v3, %v1499_v16  ;;  %v1496_v19 = vpop.xlane.xlu0 %1495 }
0x1164   :  { %v1500_v30 = vsub.f32 %v1492_v4, %v1496_v19 }
0x1165   :  { %v1504_v20 = vmul.f32 1.442695, %v1501_v18 }
0x1166   :  { %v1502_v32 = vmul.f32 1.442695, %v1500_v30 }
0x1167   :  { %2805 = vpow2.f32 %v1504_v20  ;;  %v1100_v20 = vld [vmem:[#allocation2 + $0xe8] sm:$0xff] }
0x1168   :  { %2807 = vpow2.f32 %v1502_v32 }
0x1169   :  { %v2802_v21 = vpop.eup %2801 }
0x116a   :  { %v2804_v22 = vpop.eup %2803  ;;  %v1305_v23 = vsel %vm319_vm3, %v2802_v21, 0.0 }
0x116b   :  { %1306 = vadd.xlane.f32.xlu1 %v1305_v23  ;;  %v1302_v24 = vsel %vm319_vm3, %v2804_v22, 0.0 }
0x116c   :  { %1303 = vadd.xlane.f32.xlu0 %v1302_v24 }
0x1171   :  { %v2806_v25 = vpop.eup %2805 }
0x1172   :  { %v2808_v26 = vpop.eup %2807  ;;  %v1509_v13 = vsel %vm319_vm3, %v2806_v25, 0.0 }
0x1173   :  { %1510 = vadd.xlane.f32.xlu1 %v1509_v13  ;;  %v1506_v29 = vsel %vm319_vm3, %v2808_v26, 0.0 }
0x1174   :  { %1507 = vadd.xlane.f32.xlu0 %v1506_v29 }
0x1184   :  { %2765 = vrot.lane.b32.xlu1 %v3124_v47, %s2865_s8 }
0x118a   :  { %2760 = vrot.lane.b32.xlu0 %v3124_v47, %s2863_s30 }
0x11f8   :  { %v1307_v27 = vpop.xlane.xlu1 %1306 }
0x11f9   :  { %v1304_v31 = vpop.xlane.xlu0 %1303 }
0x11fa   :  { %2809 = vrcp.f32 %v1304_v31 }
0x11fb   :  { %2811 = vrcp.f32 %v1307_v27 }
0x1200   :  { %v1511_v33 = vpop.xlane.xlu1 %1510 }
0x1201   :  { %v1508_v34 = vpop.xlane.xlu0 %1507 }
0x1202   :  { %2813 = vrcp.f32 %v1508_v34 }
0x1203   :  { %2815 = vrcp.f32 %v1511_v33  ;;  %v2202_v33 = vld [vmem:[%s3222_s5 + $0xc] ss:$0 sm:$0xff] }
0x1204   :  { %v2810_v28 = vpop.eup %2809  ;;  %v2766_v35 = vpop.permute.xlu1 %2765 }
0x1205   :  { %v2761_v36 = vpop.permute.xlu0 %2760  ;;  %v1309_v37 = vmul.f32 %v2810_v28, %v2804_v22  ;;  %v2768_v38 = vunpack.i.h.bf16 %v2766_v35  ;;  %v2767_v39 = vunpack.i.l.bf16 %v2766_v35  ;;  %v2812_v45 = vpop.eup %2811  ;;  %v1102_v22 = vld [vmem:[#allocation2 + $0xf8] sm:$0xff] }
0x1206   :  { %v2763_v42 = vunpack.i.h.bf16 %v2761_v36  ;;  %v2762_v43 = vunpack.i.l.bf16 %v2761_v36  ;;  %v1311_v48 = vmul.f32 %v2812_v45, %v2802_v21  ;;  %v1101_v21 = vld [vmem:[#allocation2 + $0xf0] sm:$0xff] }
0x1207   :  { %2469 = vmatprep.mubr.msk.f32.mxu0 %vm319_vm3, %v1309_v37  ;;  %v2665_v46 = vpack.c.bf16 %v2768_v38, %v2767_v39  ;;  %v2681_v23 = vpack.c.bf16 %v1102_v22, %v1101_v21  ;;  %v2203_v37 = vld [vmem:[%s3222_s5 + $0xd] ss:$0 sm:$0xff] }
0x1208   :  { %v2655_v44 = vpack.c.bf16 %v2763_v42, %v2762_v43  ;;  %v1103_v43 = vld [vmem:[#allocation2 + $0x100] sm:$0xff] }
0x120a   :  { %2656 = vmatprep.subr.bf16.mxu0 %v2655_v44 }
0x120b   :  { %2658 = vmatpush3.bf16.msra.mxu0 %v2655_v44  ;;  %v1104_v44 = vld [vmem:[#allocation2 + $0x108] sm:$0xff] }
0x120c   :  { %v2814_v47 = vpop.eup %2813  ;;  %2666 = vmatprep.subr.bf16.mxu0 %v2665_v46  ;;  %v2685_v45 = vpack.c.bf16 %v1104_v44, %v1103_v43 }
0x120d   :  { %v2816_v49 = vpop.eup %2815  ;;  %v1513_v50 = vmul.f32 %v2814_v47, %v2808_v26  ;;  %v1106_v47 = vld [vmem:[#allocation2 + $0x118] sm:$0xff] }
0x120e   :  { %2470 = vmatmul.mubr.msk.f32.vlgmr.msra.gmra.mrb[6].mxu0 %vm319_vm3, %v1311_v48  ;;  %v1515_v51 = vmul.f32 %v2816_v49, %v2806_v25  ;;  %v1107_v48 = vld [vmem:[#allocation2 + $0x120] sm:$0xff] }
0x120f   :  { %2668 = vmatpush3.bf16.msra.mxu0 %v2665_v46  ;;  %2483 = vmatprep.mubr.msk.f32.mxu0 %vm319_vm3, %v1513_v50  ;;  %v1105_v46 = vld [vmem:[#allocation2 + $0x110] sm:$0xff]  ;;  %v1108_v50 = vld [vmem:[#allocation2 + $0x128] sm:$0xff] }
0x1210   :  { %2670 = vmatprep.subr.bf16.mxu0 %v2669_v55  ;;  %v2689_v49 = vpack.c.bf16 %v1106_v47, %v1105_v46 }
0x1212   :  { %2484 = vmatmul.mubr.msk.f32.vlgmr.msra.gmra.mrb[8].mxu0 %vm319_vm3, %v1515_v51  ;;  %v2693_v51 = vpack.c.bf16 %v1108_v50, %v1107_v48  ;;  %v2210_v48 = vld [vmem:[%s3222_s5 + $0x10] ss:$0 sm:$0xff] }
0x1213   :  { %2672 = vmatpush3.bf16.msra.mxu0 %v2669_v55  ;;  %v2204_v55 = vld [vmem:[%s3222_s5 + $0xe] ss:$0 sm:$0xff] }
0x1214   :  { %2674 = vmatprep.subr.bf16.mxu0 %v2673_v57 }
0x1217   :  { %2676 = vmatpush3.bf16.msra.mxu0 %v2673_v57 }
0x1218   :  { %2686 = vmatprep.subr.bf16.mxu0 %v2685_v45 }
0x12e1   :  { %v2471_v58 = vpop.f32.mrb[6].mxu0 }
0x12e2   :  { %v1390_v59 = vpop.f32.mrb[7].mxu0 }
0x12e5   :  { %v2485_v60 = vpop.f32.mrb[8].mxu0 }
0x12e6   :  { %1607 = vrot.lane.b32.xlu0 %v2485_v60, %s2866_s9  ;;  %v1594_v61 = vpop.f32.mrb[9].mxu0 }
0x12e7   :  { %1605 = vrot.lane.b32.xlu1 %v1594_v61, %s2866_s9 }
0x1358   :  { %v1608_v62 = vpop.permute.xlu0 %1607 }
0x1359   :  { %v1606_v63 = vpop.permute.xlu1 %1605  ;;  %v1612_v7 = vsel %vm319_vm3, %v2471_v58, %v1608_v62 }
0x135a   :  { %v1611_v0 = vsel %vm319_vm3, %v1390_v59, %v1606_v63 }
0x135b   :  { %2494 = vmatprep.mubr.msk.f32.mxu0 %vm146_vm2, %v1611_v0 }
0x135c   :  { %2495 = vmatmul.mubr.msk.f32.vlgmr.msra.gmra.mrb[10].mxu0 %vm146_vm2, %v1612_v7 }
0x135d   :  { %2688 = vmatpush3.bf16.msra.mxu0 %v2685_v45 }
0x135e   :  { %2690 = vmatprep.subr.bf16.mxu0 %v2689_v49 }
0x1361   :  { %2692 = vmatpush3.bf16.msra.mxu0 %v2689_v49 }
0x1362   :  { %2694 = vmatprep.subr.bf16.mxu0 %v2693_v51 }
0x1365   :  { %2696 = vmatpush3.bf16.msra.mxu0 %v2693_v51 }
0x1366   :  { %2698 = vmatprep.subr.bf16.mxu0 %v2697_v54 }
0x1369   :  { %2700 = vmatpush3.bf16.msra.mxu0 %v2697_v54 }
0x142f   :  { %v2496_v5 = vpop.f32.mrb[10].mxu0 }
0x1430   :  { %v1696_v1 = vadd.f32 %v2496_v5, %v2199_v17  ;;  %v1690_v2 = vpop.f32.mrb[11].mxu0 }
0x1431   :  { %v1691_v3 = vadd.f32 %v2199_v17, %v1690_v2 }
0x1432   :  { %v1700_v4 = vadd.f32 %v1696_v1, %v3114_v41 }
0x1433   :  { %v1699_v6 = vadd.f32 %v1691_v3, %v3112_v40  ;;  %v1099_v40 = vld [vmem:[#allocation2 + $0xe0] sm:$0xff] }
0x1434   :  { %v1704_v8 = vsel %vm146_vm2, %v1700_v4, 0.0  ;;  %v2677_v32 = vpack.c.bf16 %v1100_v20, %v1099_v40 }
0x1435   :  { %1705 = vadd.xlane.f32.xlu0 %v1704_v8  ;;  %v1701_v9 = vsel %vm146_vm2, %v1699_v6, 0.0 }
0x1436   :  { %1702 = vadd.xlane.f32.xlu1 %v1701_v9  ;;  %2678 = vmatprep.subr.bf16.mxu1 %v2677_v32 }
0x1437   :  { %2680 = vmatpush3.bf16.msra.mxu1 %v2677_v32 }
0x1438   :  { %2682 = vmatprep.subr.bf16.mxu1 %v2681_v23 }
0x143b   :  { %2684 = vmatpush3.bf16.msra.mxu1 %v2681_v23 }
0x14c2   :  { %v1706_v10 = vpop.xlane.xlu0 %1705 }
0x14c3   :  { %v1708_v11 = vmul.f32 0.03125, %v1706_v10  ;;  %v1703_v12 = vpop.xlane.xlu1 %1702 }
0x14c4   :  { %v1707_v14 = vmul.f32 0.03125, %v1703_v12 }
0x14c5   :  { %v1710_v15 = vsub.f32 %v1700_v4, %v1708_v11 }
0x14c6   :  { %v1709_v16 = vsub.f32 %v1699_v6, %v1707_v14  ;;  %v2207_v14 = vld [vmem:[%s3222_s5 + $0xf] ss:$0 sm:$0xff] }
0x14c7   :  { %v1712_v18 = vmul.f32 %v1710_v15, %v1710_v15 }
0x14c8   :  { %v1711_v19 = vmul.f32 %v1709_v16, %v1709_v16 }
0x14c9   :  { %v1716_v30 = vsel %vm146_vm2, %v1712_v18, 0.0 }
0x14ca   :  { %1717 = vadd.xlane.f32.xlu1 %v1716_v30  ;;  %v1713_v41 = vsel %vm146_vm2, %v1711_v19, 0.0 }
0x14cb   :  { %1714 = vadd.xlane.f32.xlu0 %v1713_v41 }
0x1557   :  { %v1718_v24 = vpop.xlane.xlu1 %1717 }
0x1558   :  { %v1720_v25 = vmul.f32 0.03125, %v1718_v24  ;;  %v1715_v26 = vpop.xlane.xlu0 %1714 }
0x1559   :  { %v1719_v13 = vmul.f32 0.03125, %v1715_v26 }
0x155a   :  { %v1722_v29 = vadd.f32 1e-12, %v1720_v25 }
0x155b   :  { %v1721_v31 = vadd.f32 1e-12, %v1719_v13 }
0x155c   :  { %2817 = vrsqrt.f32 %v1722_v29 }
0x155d   :  { %2819 = vrsqrt.f32 %v1721_v31 }
0x1566   :  { %v2818_v27 = vpop.eup %2817 }
0x1567   :  { %v2820_v34 = vpop.eup %2819  ;;  %v1726_v28 = vmul.f32 %v2818_v27, %v1710_v15  ;;  %v1973_v27 = vld [vmem:[#allocation2 + $0x140] sm:$0xff] }
0x1568   :  { %v1725_v35 = vmul.f32 %v2820_v34, %v1709_v16 }
0x1569   :  { %v1733_v36 = vmul.f32 %v2202_v33, %v1726_v28  ;;  %v2867_v28 = vmov 0.0|0.0  }
0x156a   :  { %v1732_v38 = vmul.f32 %v2202_v33, %v1725_v35  ;;  %v1974_v33 = vld [vmem:[#allocation2 + $0x148] sm:$0xff]  ;;  %2701 = vmatprep.subr.bf16.mxu1 %v2867_v28  ;;  %v1975_v35 = vld [vmem:[#allocation2 + $0x150] sm:$0xff] }
0x156b   :  { %v1740_v42 = vadd.f32 %v2203_v37, %v1733_v36  ;;  %v2702_v34 = vpack.c.bf16 %v1974_v33, %v1973_v27  ;;  %v1976_v36 = vld [vmem:[#allocation2 + $0x158] sm:$0xff] }
0x156c   :  { %v1739_v39 = vadd.f32 %v2203_v37, %v1732_v38  ;;  %v2705_v37 = vpack.c.bf16 %v1976_v36, %v1975_v35  ;;  %v2869_v38 = vmov 0.0  }
0x156e   :  { %2505 = vmatprep.mubr.msk.f32.mxu1 %vm146_vm2, %v1739_v39 }
0x156f   :  { %2506 = vmatmul.mubr.msk.f32.vlgmr.msra.gmra.mrb[18].mxu1 %vm146_vm2, %v1740_v42 }
0x1570   :  { %2703 = vmatpush3.bf16.msra.mxu1 %v2702_v34  ;;  %2535 = vmatprep.mubr.msk.f32.mxu1 %vm2868_vm8, %v2869_v38 }
0x1571   :  { %2704 = vmatprep.subr.bf16.mxu1 %v2867_v28 }
0x1574   :  { %2706 = vmatpush3.bf16.msra.mxu1 %v2705_v37 }
0x1575   :  { %2707 = vmatprep.subr.bf16.mxu1 %v2867_v28 }
0x1642   :  { %v2507_v56 = vpop.f32.mrb[18].mxu1 }
0x1643   :  { %v1824_v57 = vadd.f32 %v2507_v56, %v2204_v55  ;;  %v1818_v58 = vpop.f32.mrb[19].mxu1 }
0x1644   :  { %v1819_v59 = vadd.f32 %v2204_v55, %v1818_v58 }
0x1645   :  { %v1830_v60 = vmul.f32 0.044715, %v1824_v57  ;;  %v1828_v10 = vmul.f32 0.5, %v1824_v57 }
0x1646   :  { %v1829_v61 = vmul.f32 0.044715, %v1819_v59  ;;  %v1827_v8 = vmul.f32 0.5, %v1819_v59 }
0x1647   :  { %v1832_v62 = vmul.f32 %v1830_v60, %v1824_v57  ;;  %v1978_v60 = vld [vmem:[#allocation2 + $0x168] sm:$0xff] }
0x1648   :  { %v1831_v63 = vmul.f32 %v1829_v61, %v1819_v59  ;;  %v1979_v61 = vld [vmem:[#allocation2 + $0x170] sm:$0xff] }
0x1649   :  { %v1834_v0 = vmul.f32 %v1832_v62, %v1824_v57 }
0x164a   :  { %v1833_v7 = vmul.f32 %v1831_v63, %v1819_v59  ;;  %v1980_v63 = vld [vmem:[#allocation2 + $0x178] sm:$0xff] }
0x164b   :  { %v1836_v17 = vadd.f32 %v1834_v0, %v1824_v57  ;;  %v2711_v0 = vpack.c.bf16 %v1980_v63, %v1979_v61 }
0x164c   :  { %v1835_v5 = vadd.f32 %v1833_v7, %v1819_v59  ;;  %v1977_v59 = vld [vmem:[#allocation2 + $0x160] sm:$0xff]  ;;  %v2212_v7 = vld [vmem:[%s3222_s5 + $0x12] ss:$0 sm:$0xff] }
0x164d   :  { %v1838_v1 = vmul.f32 0.7978846, %v1836_v17  ;;  %v2708_v62 = vpack.c.bf16 %v1978_v60, %v1977_v59 }
0x164e   :  { %v1837_v2 = vmul.f32 0.7978846, %v1835_v5 }
0x164f   :  { %2821 = vtanh.f32 %v1838_v1 }
0x1650   :  { %2823 = vtanh.f32 %v1837_v2 }
0x1659   :  { %v2822_v3 = vpop.eup %2821 }
0x165a   :  { %v2824_v4 = vpop.eup %2823  ;;  %v1842_v6 = vadd.f32 1.0, %v2822_v3  ;;  %v2214_v3 = vld [vmem:[%s3222_s5 + $0x13] ss:$0 sm:$0xff] }
0x165b   :  { %v1841_v9 = vadd.f32 1.0, %v2824_v4 }
0x165c   :  { %v1844_v12 = vmul.f32 %v1842_v6, %v1828_v10 }
0x165d   :  { %v1843_v11 = vmul.f32 %v1841_v9, %v1827_v8 }
0x165f   :  { %2524 = vmatprep.mubr.msk.f32.mxu0 %vm967_vm7, %v1843_v11 }
0x1660   :  { %2525 = vmatmul.mubr.msk.f32.vlgmr.msra.gmra.mrb[12].mxu0 %vm967_vm7, %v1844_v12 }
0x1733   :  { %v2526_v15 = vpop.f32.mrb[12].mxu0 }
0x1734   :  { %v1928_v16 = vadd.f32 %v2526_v15, %v2207_v14  ;;  %v1922_v18 = vpop.f32.mrb[13].mxu0 }
0x1735   :  { %v1923_v19 = vadd.f32 %v2207_v14, %v1922_v18 }
0x1736   :  { %v1932_v30 = vadd.f32 %v1928_v16, %v1740_v42 }
0x1737   :  { %v1931_v41 = vadd.f32 %v1923_v19, %v1739_v39 }
0x1738   :  { %v1936_v40 = vsel %vm146_vm2, %v1932_v30, 0.0 }
0x1739   :  { %1937 = vadd.xlane.f32.xlu0 %v1936_v40  ;;  %v1933_v20 = vsel %vm146_vm2, %v1931_v41, 0.0 }
0x173a   :  { %1934 = vadd.xlane.f32.xlu1 %v1933_v20 }
0x17c6   :  { %v1938_v32 = vpop.xlane.xlu0 %1937 }
0x17c7   :  { %v1940_v21 = vmul.f32 0.03125, %v1938_v32  ;;  %v1935_v22 = vpop.xlane.xlu1 %1934 }
0x17c8   :  { %v1939_v23 = vmul.f32 0.03125, %v1935_v22 }
0x17c9   :  { %v1942_v24 = vsub.f32 %v1932_v30, %v1940_v21 }
0x17ca   :  { %v1941_v25 = vsub.f32 %v1931_v41, %v1939_v23 }
0x17cb   :  { %v1944_v26 = vmul.f32 %v1942_v24, %v1942_v24 }
0x17cc   :  { %v1943_v13 = vmul.f32 %v1941_v25, %v1941_v25 }
0x17cd   :  { %v1948_v29 = vsel %vm146_vm2, %v1944_v26, 0.0 }
0x17ce   :  { %1949 = vadd.xlane.f32.xlu0 %v1948_v29  ;;  %v1945_v31 = vsel %vm146_vm2, %v1943_v13, 0.0 }
0x17cf   :  { %1946 = vadd.xlane.f32.xlu1 %v1945_v31 }
0x185b   :  { %v1950_v39 = vpop.xlane.xlu0 %1949 }
0x185c   :  { %v1952_v42 = vmul.f32 0.03125, %v1950_v39  ;;  %v1947_v43 = vpop.xlane.xlu1 %1946 }
0x185d   :  { %v1951_v44 = vmul.f32 0.03125, %v1947_v43 }
0x185e   :  { %v1954_v45 = vadd.f32 1e-12, %v1952_v42 }
0x185f   :  { %v1953_v46 = vadd.f32 1e-12, %v1951_v44 }
0x1860   :  { %2825 = vrsqrt.f32 %v1954_v45 }
0x1861   :  { %2827 = vrsqrt.f32 %v1953_v46 }
0x186a   :  { %v2826_v47 = vpop.eup %2825 }
0x186b   :  { %v2828_v49 = vpop.eup %2827  ;;  %v1958_v50 = vmul.f32 %v2826_v47, %v1942_v24 }
0x186c   :  { %v1957_v51 = vmul.f32 %v2828_v49, %v1941_v25 }
0x186d   :  { %v1965_v53 = vmul.f32 %v2210_v48, %v1958_v50 }
0x186e   :  { %v1964_v54 = vmul.f32 %v2210_v48, %v1957_v51 }
0x186f   :  { %v1972_v55 = vadd.f32 %v2211_v52, %v1965_v53 }
0x1870   :  { %v1971_v56 = vadd.f32 %v2211_v52, %v1964_v54 }
0x1871   :  { %v1982_v57 = vrot.slane %v1972_v55, 7 }
0x1873   :  { %v1985_v58 = vsel %vm1984_vm9, %v1971_v56, %v1982_v57 }
0x1874   :  { %2536 = vmatmul.mubr.msk.f32.vlgmr.msra.gmra.mrb[20].mxu1 %vm146_vm2, %v1985_v58 }
0x1875   :  { %2546 = vmatprep.mubr.msk.f32.mxu1 %vm2868_vm8, %v2869_v38  ;;  %2709 = vmatpush3.bf16.msra.mxu1 %v2708_v62 }
0x1876   :  { %2710 = vmatprep.subr.bf16.mxu1 %v2867_v28 }
0x1879   :  { %2712 = vmatpush3.bf16.msra.mxu1 %v2711_v0 }
0x1947   :  { %v2060_v17 = vpop.f32.mrb[20].mxu1 }
0x1948   :  { %v2061_v5 = vadd.f32 %v2212_v7, %v2060_v17  ;;  %v2537_v1 = vpop.f32.mrb[21].mxu1 }
0x194a   :  { %2829 = vtanh.f32 %v2061_v5 }
0x1954   :  { %v2830_v2 = vpop.eup %2829 }
0x1955   :  { %2547 = vmatmul.mubr.msk.f32.vlgmr.msra.gmra.mrb[22].mxu1 %vm146_vm2, %v2830_v2 }
0x1a28   :  { %v2139_v4 = vpop.f32.mrb[22].mxu1 }
0x1a29   :  { %v2140_v6 = vadd.f32 %v2214_v3, %v2139_v4  ;;  %v2548_v8 = vpop.f32.mrb[23].mxu1 }
0x1a2b   :  { %2143 = vst [vmem:[%s3223_s6] sm:$0x3] %v2140_v6 }
0x1a2c   :  { %2148 = vsyncpa [#allocation3], 1 }

</bundles_post_ra>
